<compile_context>
chip_gen: v7x
topology: tpu7x:2x2x1
jax: 0.10.0
libtpu: 0.0.40
codegen_flags: <defaults>
</compile_context>

<pallas_src>
import functools

import jax
import jax.numpy as jnp
import numpy as np
from jax import lax
from jax.experimental import pallas as pl
from jax.experimental.pallas import tpu as pltpu


# ----------------------------- Pallas kernel ---------------------------------

def _psconv_kernel(x_ref, w_ref, o_ref, patch_ref, *, tile_h, out_w, tap_offsets):
    """One (batch, H-tile) grid step.

    x_ref     : (band_h, W + 2*pad, Cin)  input band incl. halo rows        (VMEM)
    w_ref     : (K, Cout_pad)             fused weight slab, VMEM-resident  (VMEM)
    o_ref     : (tile_h * W, Cout_pad)    lane-dense output slab            (VMEM)
    patch_ref : (tile_h * W, K)           im2col scratch                    (VMEM)
    """
    cin = x_ref.shape[-1]
    s = tile_h * out_w
    # im2col: one (S, Cin) column block per (branch, kh, kw) tap.
    # All slice starts are static Python ints.
    for t, (oh, ow) in enumerate(tap_offsets):
        win = x_ref[oh:oh + tile_h, ow:ow + out_w, :]
        patch_ref[:, t * cin:(t + 1) * cin] = win.reshape(s, cin)
    # Single big MXU contraction over K = n_branch * 9 * Cin, f32 accumulation.
    o_ref[...] = jnp.dot(patch_ref[...], w_ref[...],
                         preferred_element_type=jnp.float32).astype(o_ref.dtype)


# ------------------------------- wrapper --------------------------------------

def psconv2d_forward(x_nchw, w_gw_dense, w_conv_masked, w_shift_dense, *,
                     dilation=1, padding=1, tile_h=None, compute_dtype=None):
    """PSConv2d forward.

    x_nchw        : (N, Cin, H, W)
    w_gw_dense    : (Cout, Cin, 3, 3) gwconv weight expanded to block-diagonal dense
    w_conv_masked : (Cout, Cin, 3, 3) conv weight with the PSConv mask already zeroed
    w_shift_dense : (Cout, Cin, 3, 3) gwconv_shift weight expanded to dense
    """
    n, cin, h, w = x_nchw.shape
    cout = w_gw_dense.shape[0]
    if padding != 1:
        raise ValueError("PSConv2d only produces shape-consistent outputs for "
                         "padding=1 (the dense conv branch has dilation 1).")
    if cin % 2:
        raise ValueError("in_channels must be even (x.chunk(2, dim=1)).")
    d = int(dilation)
    pad = 2 * d                                 # max halo over all branches
    out_dtype = x_nchw.dtype
    cdt = np.dtype(compute_dtype) if compute_dtype is not None else np.dtype(out_dtype)

    # ---- fold / merge weights host-side --------------------------------------
    # gwconv_shift(cat(x2, x1)) == conv2d(x, roll(w_shift, -Cin//2, axis=Cin)).
    w_shift_folded = jnp.roll(w_shift_dense, -(cin // 2), axis=1)
    # branch := (dense OIHW weight, dilation, tap-offset base = max_pad - pad_branch)
    branches = [(w_shift_folded, 2 * d, 0)]
    if d == 1:
        # gwconv (dil=1, pad=1) and conv (dil=1, pad=1) read identical windows:
        # merge their weights -> drops 9 of the 27 taps.
        branches.append((w_gw_dense + w_conv_masked, 1, pad - 1))
    else:
        branches.append((w_gw_dense, d, pad - d))
        branches.append((w_conv_masked, 1, pad - 1))
    nb = len(branches)
    k_dim = nb * 9 * cin

    # Fused (K, Cout_pad) weight slab; rows ordered (branch, kh, kw, cin) to match the
    # kernel's im2col column order.  Cout is padded to a multiple of 128 so every
    # output store is lane-dense (unmasked vst); the pad costs no extra MXU work.
    def _rows(w_oihw):
        return jnp.transpose(w_oihw, (2, 3, 1, 0)).reshape(9 * cin, cout)
    slab = jnp.concatenate([_rows(wb) for (wb, _, _) in branches], axis=0)
    cout_p = ((cout + 127) // 128) * 128
    if cout_p != cout:
        slab = jnp.pad(slab, ((0, 0), (0, cout_p - cout)))
    slab = slab.astype(cdt)

    # Static tap offsets inside a band (same base offset applies to H and W).
    tap_offsets = tuple((base + kh * db, base + kw * db)
                        for (_, db, base) in branches
                        for kh in range(3) for kw in range(3))

    # ---- choose the H-row tile against a VMEM budget --------------------------
    if tile_h is None:
        # ~2 MiB im2col patch per tile keeps (double-buffered bands + output slabs +
        # weight slab + scratch) well inside v7x's 32 MiB scoped VMEM.
        patch_row_bytes = k_dim * cdt.itemsize
        s_target = int(min(max((2 * 1024 * 1024) // max(patch_row_bytes, 1), 128), 2048))
        tile_h = max(1, min(h, s_target // max(w, 1)))
        if tile_h >= 8:
            tile_h -= tile_h % 8        # keep the in-kernel reshape sublane-friendly
    n_h = pl.cdiv(h, tile_h)
    h_up = n_h * tile_h
    band_h = tile_h + 2 * pad
    w_p = w + 2 * pad
    s_dim = tile_h * w

    # ---- one padded copy of x, then overlapping H bands -----------------------
    # A single max-padded activation replaces the three per-branch padded copies of
    # the previous version.  Bands duplicate only the 2*pad halo rows and let the
    # grid use plain non-overlapping Blocked tiles.
    # TODO(synk): express the halo directly with an element-indexed BlockSpec
    # (overlapping windows) to avoid materializing the banded copy in the wrapper.
    x_nhwc = jnp.transpose(x_nchw, (0, 2, 3, 1)).astype(cdt)
    x_padded = jnp.pad(x_nhwc, ((0, 0), (pad, pad + (h_up - h)), (pad, pad), (0, 0)))
    x_bands = jnp.stack(
        [x_padded[:, i * tile_h: i * tile_h + band_h] for i in range(n_h)], axis=1)
    # -> (N, n_h, band_h, W + 2*pad, Cin)

    kernel = functools.partial(_psconv_kernel, tile_h=tile_h, out_w=w,
                               tap_offsets=tap_offsets)

    out = pl.pallas_call(
        kernel,
        out_shape=jax.ShapeDtypeStruct((n, n_h, s_dim, cout_p), out_dtype),
        grid=(n, n_h),
        in_specs=[
            # activation band: new block each grid step -> auto double-buffered DMA
            pl.BlockSpec((None, None, band_h, w_p, cin),
                         lambda b, i: (b, i, 0, 0, 0)),
            # weight slab: constant index_map -> DMA'd once, VMEM-resident
            pl.BlockSpec((k_dim, cout_p), lambda b, i: (0, 0)),
        ],
        out_specs=pl.BlockSpec((None, None, s_dim, cout_p),
                               lambda b, i: (b, i, 0, 0)),
        scratch_shapes=[pltpu.VMEM((s_dim, k_dim), cdt)],
        compiler_params=pltpu.CompilerParams(
            dimension_semantics=("parallel", "parallel"),   # megacore split on v7x
            vmem_limit_bytes=32 * 1024 * 1024),
    )(x_bands, slab)

    # Undo the lane-dense layout plumbing: (N, n_h, tile_h*W, Cout_p) -> NCHW.
    out = out.reshape(n, n_h, tile_h, w, cout_p)[..., :cout]
    out = out.reshape(n, h_up, w, cout)[:, :h]
    return jnp.transpose(out, (0, 3, 1, 2))


# ---------------- deterministic parameter construction (matches __init__) -----

def expand_group_weight(w_group, parts):
    """(Cout, Cin//parts, 3, 3) grouped weight -> block-diagonal dense (Cout, Cin, 3, 3)."""
    Cout, cin_g, kh, kw = w_group.shape
    cout_g = Cout // parts
    Cin = cin_g * parts
    dense = jnp.zeros((Cout, Cin, kh, kw), w_group.dtype)
    for g in range(parts):
        dense = dense.at[g * cout_g:(g + 1) * cout_g,
                         g * cin_g:(g + 1) * cin_g].set(
            w_group[g * cout_g:(g + 1) * cout_g])
    return dense


def build_conv_mask(Cout, Cin, parts):
    """Boolean mask matching PSConv2d.__init__ (positions that are zeroed)."""
    mask = jnp.zeros((Cout, Cin, 3, 3), bool)
    oc_g, ic_g = Cout // parts, Cin // parts
    for i in range(parts):
        mask = mask.at[i * oc_g:(i + 1) * oc_g,
                       i * ic_g:(i + 1) * ic_g].set(True)
        j = (i + parts // 2) % parts
        mask = mask.at[j * oc_g:(j + 1) * oc_g,
                       i * ic_g:(i + 1) * ic_g].set(True)
    return mask


# ---------------- pure-JAX reference (independent of the folding tricks) ------

def ref_forward(x, wg_dense, wc_masked, ws_dense, dilation, padding):
    def conv(a, wt, p, dil):
        return lax.conv_general_dilated(
            a, wt, window_strides=(1, 1),
            padding=[(p, p), (p, p)],
            rhs_dilation=(dil, dil),
            dimension_numbers=('NCHW', 'OIHW', 'NCHW'))
    Cin = x.shape[1]
    x_shift = jnp.concatenate([x[:, Cin // 2:], x[:, :Cin // 2]], axis=1)
    return (conv(x, wg_dense, dilation, dilation)
            + conv(x, wc_masked, padding, 1)
            + conv(x_shift, ws_dense, 2 * dilation, 2 * dilation))


if __name__ == "__main__":
    N, Cin, Cout, H, W, parts = 2, 8, 8, 16, 16, 4

    key = jax.random.PRNGKey(0)
    k1, k2, k3, k4 = jax.random.split(key, 4)
    x = jax.random.normal(k1, (N, Cin, H, W), jnp.float32)
    # Parameter shapes from PSConv2d.__init__ (bias=False):
    w_gw_grp = jax.random.normal(k2, (Cout, Cin // parts, 3, 3), jnp.float32) * 0.1
    w_sh_grp = jax.random.normal(k3, (Cout, Cin // parts, 3, 3), jnp.float32) * 0.1
    w_conv = jax.random.normal(k4, (Cout, Cin, 3, 3), jnp.float32) * 0.1

    wg_dense = expand_group_weight(w_gw_grp, parts)
    ws_dense = expand_group_weight(w_sh_grp, parts)
    mask = build_conv_mask(Cout, Cin, parts)
    wc_masked = jnp.where(mask, 0.0, w_conv)     # conv.weight.data[mask] = 0

    # 1) f32, explicit tile_h=8 -> grid (2, 2): exercises the halo/banding path.
    out = psconv2d_forward(x, wg_dense, wc_masked, ws_dense,
                           dilation=1, padding=1, tile_h=8)
    out = jax.block_until_ready(out)
    ref = ref_forward(x, wg_dense, wc_masked, ws_dense, 1, 1)
    assert out.shape == (N, Cout, H, W)
    assert jnp.allclose(out, ref, atol=1e-3, rtol=1e-3), \
        float(jnp.max(jnp.abs(out - ref)))

    # 2) dilation=2 -> three-branch (non-merged) path, default tile heuristic.
    out2 = psconv2d_forward(x, wg_dense, wc_masked, ws_dense, dilation=2, padding=1)
    out2 = jax.block_until_ready(out2)
    ref2 = ref_forward(x, wg_dense, wc_masked, ws_dense, 2, 1)
    assert jnp.allclose(out2, ref2, atol=1e-3, rtol=1e-3), \
        float(jnp.max(jnp.abs(out2 - ref2)))

    # 3) bf16 compute dtype (MXU-native on v6e/v7x), f32 accumulation.
    out_bf = psconv2d_forward(x, wg_dense, wc_masked, ws_dense,
                              dilation=1, padding=1, compute_dtype=jnp.bfloat16)
    out_bf = jax.block_until_ready(out_bf)
    assert jnp.allclose(out_bf, ref, atol=5e-2, rtol=5e-2), \
        float(jnp.max(jnp.abs(out_bf - ref)))

    print("KERNEL_OK")
</pallas_src>

<mosaic_0001>
module attributes {stable_mosaic.version = 11 : i64} {
  func.func @_psconv_kernel(%arg0: i32, %arg1: i32, %arg2: memref<1x1x12x20x8xf32, #tpu.memory_space<vmem>>, %arg3: memref<144x128xf32, #tpu.memory_space<vmem>>, %arg4: memref<1x1x128x128xf32, #tpu.memory_space<vmem>>, %arg5: memref<128x144xf32, #tpu.memory_space<vmem>>) attributes {dimension_semantics = [#tpu.dimension_semantics<parallel>, #tpu.dimension_semantics<parallel>], iteration_bounds = array<i64: 2, 2>, scalar_prefetch = 0 : i64, scratch_operands = 1 : i64, tpu.core_type = #tpu.core_type<tc>, window_params = [{transform_indices = @transform_0, window_bounds = array<i64: 1, 1, 12, 20, 8>}, {pipeline_mode = #tpu.pipeline_mode<synchronous>, transform_indices = @transform_1, window_bounds = array<i64: 144, 128>}, {transform_indices = @transform_2, window_bounds = array<i64: 1, 1, 128, 128>}]} {
    %c0 = arith.constant 0 : index
    %c0_0 = arith.constant 0 : index
    %c0_1 = arith.constant 0 : index
    %c0_2 = arith.constant 0 : index
    %c0_3 = arith.constant 0 : index
    %0 = vector.load %arg2[%c0, %c0_0, %c0_1, %c0_2, %c0_3] : memref<1x1x12x20x8xf32, #tpu.memory_space<vmem>>, vector<1x1x8x16x8xf32>
    %1 = vector.shape_cast %0 : vector<1x1x8x16x8xf32> to vector<8x16x8xf32>
    %2 = vector.shape_cast %1 : vector<8x16x8xf32> to vector<128x8xf32>
    %c0_4 = arith.constant 0 : index
    %c0_5 = arith.constant 0 : index
    %3 = vector.load %arg5[%c0_4, %c0_5] : memref<128x144xf32, #tpu.memory_space<vmem>>, vector<128x8xf32>
    tpu.vector_store %arg5[%c0_4, %c0_5], %2 {strides = array<i32>} : memref<128x144xf32, #tpu.memory_space<vmem>>, vector<128x8xf32>,
    %c0_6 = arith.constant 0 : index
    %c0_7 = arith.constant 0 : index
    %c0_8 = arith.constant 0 : index
    %c2 = arith.constant 2 : index
    %c0_9 = arith.constant 0 : index
    %4 = vector.load %arg2[%c0_6, %c0_7, %c0_8, %c2, %c0_9] : memref<1x1x12x20x8xf32, #tpu.memory_space<vmem>>, vector<1x1x8x16x8xf32>
    %5 = vector.shape_cast %4 : vector<1x1x8x16x8xf32> to vector<8x16x8xf32>
    %6 = vector.shape_cast %5 : vector<8x16x8xf32> to vector<128x8xf32>
    %c0_10 = arith.constant 0 : index
    %c8 = arith.constant 8 : index
    %7 = vector.load %arg5[%c0_10, %c8] : memref<128x144xf32, #tpu.memory_space<vmem>>, vector<128x8xf32>
    tpu.vector_store %arg5[%c0_10, %c8], %6 {strides = array<i32>} : memref<128x144xf32, #tpu.memory_space<vmem>>, vector<128x8xf32>,
    %c0_11 = arith.constant 0 : index
    %c0_12 = arith.constant 0 : index
    %c0_13 = arith.constant 0 : index
    %c4 = arith.constant 4 : index
    %c0_14 = arith.constant 0 : index
    %8 = vector.load %arg2[%c0_11, %c0_12, %c0_13, %c4, %c0_14] : memref<1x1x12x20x8xf32, #tpu.memory_space<vmem>>, vector<1x1x8x16x8xf32>
    %9 = vector.shape_cast %8 : vector<1x1x8x16x8xf32> to vector<8x16x8xf32>
    %10 = vector.shape_cast %9 : vector<8x16x8xf32> to vector<128x8xf32>
    %c0_15 = arith.constant 0 : index
    %c16 = arith.constant 16 : index
    %11 = vector.load %arg5[%c0_15, %c16] : memref<128x144xf32, #tpu.memory_space<vmem>>, vector<128x8xf32>
    tpu.vector_store %arg5[%c0_15, %c16], %10 {strides = array<i32>} : memref<128x144xf32, #tpu.memory_space<vmem>>, vector<128x8xf32>,
    %c0_16 = arith.constant 0 : index
    %c0_17 = arith.constant 0 : index
    %c2_18 = arith.constant 2 : index
    %c0_19 = arith.constant 0 : index
    %c0_20 = arith.constant 0 : index
    %12 = vector.load %arg2[%c0_16, %c0_17, %c2_18, %c0_19, %c0_20] : memref<1x1x12x20x8xf32, #tpu.memory_space<vmem>>, vector<1x1x8x16x8xf32>
    %13 = vector.shape_cast %12 : vector<1x1x8x16x8xf32> to vector<8x16x8xf32>
    %14 = vector.shape_cast %13 : vector<8x16x8xf32> to vector<128x8xf32>
    %c0_21 = arith.constant 0 : index
    %c24 = arith.constant 24 : index
    %15 = vector.load %arg5[%c0_21, %c24] : memref<128x144xf32, #tpu.memory_space<vmem>>, vector<128x8xf32>
    tpu.vector_store %arg5[%c0_21, %c24], %14 {strides = array<i32>} : memref<128x144xf32, #tpu.memory_space<vmem>>, vector<128x8xf32>,
    %c0_22 = arith.constant 0 : index
    %c0_23 = arith.constant 0 : index
    %c2_24 = arith.constant 2 : index
    %c2_25 = arith.constant 2 : index
    %c0_26 = arith.constant 0 : index
    %16 = vector.load %arg2[%c0_22, %c0_23, %c2_24, %c2_25, %c0_26] : memref<1x1x12x20x8xf32, #tpu.memory_space<vmem>>, vector<1x1x8x16x8xf32>
    %17 = vector.shape_cast %16 : vector<1x1x8x16x8xf32> to vector<8x16x8xf32>
    %18 = vector.shape_cast %17 : vector<8x16x8xf32> to vector<128x8xf32>
    %c0_27 = arith.constant 0 : index
    %c32 = arith.constant 32 : index
    %19 = vector.load %arg5[%c0_27, %c32] : memref<128x144xf32, #tpu.memory_space<vmem>>, vector<128x8xf32>
    tpu.vector_store %arg5[%c0_27, %c32], %18 {strides = array<i32>} : memref<128x144xf32, #tpu.memory_space<vmem>>, vector<128x8xf32>,
    %c0_28 = arith.constant 0 : index
    %c0_29 = arith.constant 0 : index
    %c2_30 = arith.constant 2 : index
    %c4_31 = arith.constant 4 : index
    %c0_32 = arith.constant 0 : index
    %20 = vector.load %arg2[%c0_28, %c0_29, %c2_30, %c4_31, %c0_32] : memref<1x1x12x20x8xf32, #tpu.memory_space<vmem>>, vector<1x1x8x16x8xf32>
    %21 = vector.shape_cast %20 : vector<1x1x8x16x8xf32> to vector<8x16x8xf32>
    %22 = vector.shape_cast %21 : vector<8x16x8xf32> to vector<128x8xf32>
    %c0_33 = arith.constant 0 : index
    %c40 = arith.constant 40 : index
    %23 = vector.load %arg5[%c0_33, %c40] : memref<128x144xf32, #tpu.memory_space<vmem>>, vector<128x8xf32>
    tpu.vector_store %arg5[%c0_33, %c40], %22 {strides = array<i32>} : memref<128x144xf32, #tpu.memory_space<vmem>>, vector<128x8xf32>,
    %c0_34 = arith.constant 0 : index
    %c0_35 = arith.constant 0 : index
    %c4_36 = arith.constant 4 : index
    %c0_37 = arith.constant 0 : index
    %c0_38 = arith.constant 0 : index
    %24 = vector.load %arg2[%c0_34, %c0_35, %c4_36, %c0_37, %c0_38] : memref<1x1x12x20x8xf32, #tpu.memory_space<vmem>>, vector<1x1x8x16x8xf32>
    %25 = vector.shape_cast %24 : vector<1x1x8x16x8xf32> to vector<8x16x8xf32>
    %26 = vector.shape_cast %25 : vector<8x16x8xf32> to vector<128x8xf32>
    %c0_39 = arith.constant 0 : index
    %c48 = arith.constant 48 : index
    %27 = vector.load %arg5[%c0_39, %c48] : memref<128x144xf32, #tpu.memory_space<vmem>>, vector<128x8xf32>
    tpu.vector_store %arg5[%c0_39, %c48], %26 {strides = array<i32>} : memref<128x144xf32, #tpu.memory_space<vmem>>, vector<128x8xf32>,
    %c0_40 = arith.constant 0 : index
    %c0_41 = arith.constant 0 : index
    %c4_42 = arith.constant 4 : index
    %c2_43 = arith.constant 2 : index
    %c0_44 = arith.constant 0 : index
    %28 = vector.load %arg2[%c0_40, %c0_41, %c4_42, %c2_43, %c0_44] : memref<1x1x12x20x8xf32, #tpu.memory_space<vmem>>, vector<1x1x8x16x8xf32>
    %29 = vector.shape_cast %28 : vector<1x1x8x16x8xf32> to vector<8x16x8xf32>
    %30 = vector.shape_cast %29 : vector<8x16x8xf32> to vector<128x8xf32>
    %c0_45 = arith.constant 0 : index
    %c56 = arith.constant 56 : index
    %31 = vector.load %arg5[%c0_45, %c56] : memref<128x144xf32, #tpu.memory_space<vmem>>, vector<128x8xf32>
    tpu.vector_store %arg5[%c0_45, %c56], %30 {strides = array<i32>} : memref<128x144xf32, #tpu.memory_space<vmem>>, vector<128x8xf32>,
    %c0_46 = arith.constant 0 : index
    %c0_47 = arith.constant 0 : index
    %c4_48 = arith.constant 4 : index
    %c4_49 = arith.constant 4 : index
    %c0_50 = arith.constant 0 : index
    %32 = vector.load %arg2[%c0_46, %c0_47, %c4_48, %c4_49, %c0_50] : memref<1x1x12x20x8xf32, #tpu.memory_space<vmem>>, vector<1x1x8x16x8xf32>
    %33 = vector.shape_cast %32 : vector<1x1x8x16x8xf32> to vector<8x16x8xf32>
    %34 = vector.shape_cast %33 : vector<8x16x8xf32> to vector<128x8xf32>
    %c0_51 = arith.constant 0 : index
    %c64 = arith.constant 64 : index
    %35 = vector.load %arg5[%c0_51, %c64] : memref<128x144xf32, #tpu.memory_space<vmem>>, vector<128x8xf32>
    tpu.vector_store %arg5[%c0_51, %c64], %34 {strides = array<i32>} : memref<128x144xf32, #tpu.memory_space<vmem>>, vector<128x8xf32>,
    %c0_52 = arith.constant 0 : index
    %c0_53 = arith.constant 0 : index
    %c1 = arith.constant 1 : index
    %c1_54 = arith.constant 1 : index
    %c0_55 = arith.constant 0 : index
    %36 = vector.load %arg2[%c0_52, %c0_53, %c1, %c1_54, %c0_55] : memref<1x1x12x20x8xf32, #tpu.memory_space<vmem>>, vector<1x1x8x16x8xf32>
    %37 = vector.shape_cast %36 : vector<1x1x8x16x8xf32> to vector<8x16x8xf32>
    %38 = vector.shape_cast %37 : vector<8x16x8xf32> to vector<128x8xf32>
    %c0_56 = arith.constant 0 : index
    %c72 = arith.constant 72 : index
    %39 = vector.load %arg5[%c0_56, %c72] : memref<128x144xf32, #tpu.memory_space<vmem>>, vector<128x8xf32>
    tpu.vector_store %arg5[%c0_56, %c72], %38 {strides = array<i32>} : memref<128x144xf32, #tpu.memory_space<vmem>>, vector<128x8xf32>,
    %c0_57 = arith.constant 0 : index
    %c0_58 = arith.constant 0 : index
    %c1_59 = arith.constant 1 : index
    %c2_60 = arith.constant 2 : index
    %c0_61 = arith.constant 0 : index
    %40 = vector.load %arg2[%c0_57, %c0_58, %c1_59, %c2_60, %c0_61] : memref<1x1x12x20x8xf32, #tpu.memory_space<vmem>>, vector<1x1x8x16x8xf32>
    %41 = vector.shape_cast %40 : vector<1x1x8x16x8xf32> to vector<8x16x8xf32>
    %42 = vector.shape_cast %41 : vector<8x16x8xf32> to vector<128x8xf32>
    %c0_62 = arith.constant 0 : index
    %c80 = arith.constant 80 : index
    %43 = vector.load %arg5[%c0_62, %c80] : memref<128x144xf32, #tpu.memory_space<vmem>>, vector<128x8xf32>
    tpu.vector_store %arg5[%c0_62, %c80], %42 {strides = array<i32>} : memref<128x144xf32, #tpu.memory_space<vmem>>, vector<128x8xf32>,
    %c0_63 = arith.constant 0 : index
    %c0_64 = arith.constant 0 : index
    %c1_65 = arith.constant 1 : index
    %c3 = arith.constant 3 : index
    %c0_66 = arith.constant 0 : index
    %44 = vector.load %arg2[%c0_63, %c0_64, %c1_65, %c3, %c0_66] : memref<1x1x12x20x8xf32, #tpu.memory_space<vmem>>, vector<1x1x8x16x8xf32>
    %45 = vector.shape_cast %44 : vector<1x1x8x16x8xf32> to vector<8x16x8xf32>
    %46 = vector.shape_cast %45 : vector<8x16x8xf32> to vector<128x8xf32>
    %c0_67 = arith.constant 0 : index
    %c88 = arith.constant 88 : index
    %47 = vector.load %arg5[%c0_67, %c88] : memref<128x144xf32, #tpu.memory_space<vmem>>, vector<128x8xf32>
    tpu.vector_store %arg5[%c0_67, %c88], %46 {strides = array<i32>} : memref<128x144xf32, #tpu.memory_space<vmem>>, vector<128x8xf32>,
    %c0_68 = arith.constant 0 : index
    %c0_69 = arith.constant 0 : index
    %c2_70 = arith.constant 2 : index
    %c1_71 = arith.constant 1 : index
    %c0_72 = arith.constant 0 : index
    %48 = vector.load %arg2[%c0_68, %c0_69, %c2_70, %c1_71, %c0_72] : memref<1x1x12x20x8xf32, #tpu.memory_space<vmem>>, vector<1x1x8x16x8xf32>
    %49 = vector.shape_cast %48 : vector<1x1x8x16x8xf32> to vector<8x16x8xf32>
    %50 = vector.shape_cast %49 : vector<8x16x8xf32> to vector<128x8xf32>
    %c0_73 = arith.constant 0 : index
    %c96 = arith.constant 96 : index
    %51 = vector.load %arg5[%c0_73, %c96] : memref<128x144xf32, #tpu.memory_space<vmem>>, vector<128x8xf32>
    tpu.vector_store %arg5[%c0_73, %c96], %50 {strides = array<i32>} : memref<128x144xf32, #tpu.memory_space<vmem>>, vector<128x8xf32>,
    %c0_74 = arith.constant 0 : index
    %c0_75 = arith.constant 0 : index
    %c2_76 = arith.constant 2 : index
    %c2_77 = arith.constant 2 : index
    %c0_78 = arith.constant 0 : index
    %52 = vector.load %arg2[%c0_74, %c0_75, %c2_76, %c2_77, %c0_78] : memref<1x1x12x20x8xf32, #tpu.memory_space<vmem>>, vector<1x1x8x16x8xf32>
    %53 = vector.shape_cast %52 : vector<1x1x8x16x8xf32> to vector<8x16x8xf32>
    %54 = vector.shape_cast %53 : vector<8x16x8xf32> to vector<128x8xf32>
    %c0_79 = arith.constant 0 : index
    %c104 = arith.constant 104 : index
    %55 = vector.load %arg5[%c0_79, %c104] : memref<128x144xf32, #tpu.memory_space<vmem>>, vector<128x8xf32>
    tpu.vector_store %arg5[%c0_79, %c104], %54 {strides = array<i32>} : memref<128x144xf32, #tpu.memory_space<vmem>>, vector<128x8xf32>,
    %c0_80 = arith.constant 0 : index
    %c0_81 = arith.constant 0 : index
    %c2_82 = arith.constant 2 : index
    %c3_83 = arith.constant 3 : index
    %c0_84 = arith.constant 0 : index
    %56 = vector.load %arg2[%c0_80, %c0_81, %c2_82, %c3_83, %c0_84] : memref<1x1x12x20x8xf32, #tpu.memory_space<vmem>>, vector<1x1x8x16x8xf32>
    %57 = vector.shape_cast %56 : vector<1x1x8x16x8xf32> to vector<8x16x8xf32>
    %58 = vector.shape_cast %57 : vector<8x16x8xf32> to vector<128x8xf32>
    %c0_85 = arith.constant 0 : index
    %c112 = arith.constant 112 : index
    %59 = vector.load %arg5[%c0_85, %c112] : memref<128x144xf32, #tpu.memory_space<vmem>>, vector<128x8xf32>
    tpu.vector_store %arg5[%c0_85, %c112], %58 {strides = array<i32>} : memref<128x144xf32, #tpu.memory_space<vmem>>, vector<128x8xf32>,
    %c0_86 = arith.constant 0 : index
    %c0_87 = arith.constant 0 : index
    %c3_88 = arith.constant 3 : index
    %c1_89 = arith.constant 1 : index
    %c0_90 = arith.constant 0 : index
    %60 = vector.load %arg2[%c0_86, %c0_87, %c3_88, %c1_89, %c0_90] : memref<1x1x12x20x8xf32, #tpu.memory_space<vmem>>, vector<1x1x8x16x8xf32>
    %61 = vector.shape_cast %60 : vector<1x1x8x16x8xf32> to vector<8x16x8xf32>
    %62 = vector.shape_cast %61 : vector<8x16x8xf32> to vector<128x8xf32>
    %c0_91 = arith.constant 0 : index
    %c120 = arith.constant 120 : index
    %63 = vector.load %arg5[%c0_91, %c120] : memref<128x144xf32, #tpu.memory_space<vmem>>, vector<128x8xf32>
    tpu.vector_store %arg5[%c0_91, %c120], %62 {strides = array<i32>} : memref<128x144xf32, #tpu.memory_space<vmem>>, vector<128x8xf32>,
    %c0_92 = arith.constant 0 : index
    %c0_93 = arith.constant 0 : index
    %c3_94 = arith.constant 3 : index
    %c2_95 = arith.constant 2 : index
    %c0_96 = arith.constant 0 : index
    %64 = vector.load %arg2[%c0_92, %c0_93, %c3_94, %c2_95, %c0_96] : memref<1x1x12x20x8xf32, #tpu.memory_space<vmem>>, vector<1x1x8x16x8xf32>
    %65 = vector.shape_cast %64 : vector<1x1x8x16x8xf32> to vector<8x16x8xf32>
    %66 = vector.shape_cast %65 : vector<8x16x8xf32> to vector<128x8xf32>
    %c0_97 = arith.constant 0 : index
    %c128 = arith.constant 128 : index
    %67 = vector.load %arg5[%c0_97, %c128] : memref<128x144xf32, #tpu.memory_space<vmem>>, vector<128x8xf32>
    tpu.vector_store %arg5[%c0_97, %c128], %66 {strides = array<i32>} : memref<128x144xf32, #tpu.memory_space<vmem>>, vector<128x8xf32>,
    %c0_98 = arith.constant 0 : index
    %c0_99 = arith.constant 0 : index
    %c3_100 = arith.constant 3 : index
    %c3_101 = arith.constant 3 : index
    %c0_102 = arith.constant 0 : index
    %68 = vector.load %arg2[%c0_98, %c0_99, %c3_100, %c3_101, %c0_102] : memref<1x1x12x20x8xf32, #tpu.memory_space<vmem>>, vector<1x1x8x16x8xf32>
    %69 = vector.shape_cast %68 : vector<1x1x8x16x8xf32> to vector<8x16x8xf32>
    %70 = vector.shape_cast %69 : vector<8x16x8xf32> to vector<128x8xf32>
    %c0_103 = arith.constant 0 : index
    %c136 = arith.constant 136 : index
    %71 = vector.load %arg5[%c0_103, %c136] : memref<128x144xf32, #tpu.memory_space<vmem>>, vector<128x8xf32>
    tpu.vector_store %arg5[%c0_103, %c136], %70 {strides = array<i32>} : memref<128x144xf32, #tpu.memory_space<vmem>>, vector<128x8xf32>,
    %c0_104 = arith.constant 0 : index
    %c0_105 = arith.constant 0 : index
    %72 = vector.load %arg5[%c0_104, %c0_105] : memref<128x144xf32, #tpu.memory_space<vmem>>, vector<128x144xf32>
    %c0_106 = arith.constant 0 : index
    %c0_107 = arith.constant 0 : index
    %73 = vector.load %arg3[%c0_106, %c0_107] : memref<144x128xf32, #tpu.memory_space<vmem>>, vector<144x128xf32>
    %cst = arith.constant dense<0.000000e+00> : vector<128x128xf32>
    %74 = tpu.matmul %72, %73, %cst {dimension_numbers = #tpu.dot_dimension_numbers<[1], [0], [0], [1], [0, 0, 1, 1], [], []>} : vector<128x144xf32>, vector<144x128xf32>, vector<128x128xf32> -> vector<128x128xf32>
    %c0_108 = arith.constant 0 : index
    %c0_109 = arith.constant 0 : index
    %c0_110 = arith.constant 0 : index
    %c0_111 = arith.constant 0 : index
    %75 = vector.load %arg4[%c0_108, %c0_109, %c0_110, %c0_111] : memref<1x1x128x128xf32, #tpu.memory_space<vmem>>, vector<1x1x128x128xf32>
    %76 = vector.shape_cast %75 : vector<1x1x128x128xf32> to vector<128x128xf32>
    %77 = vector.shape_cast %74 : vector<128x128xf32> to vector<1x1x128x128xf32>
    tpu.vector_store %arg4[%c0_108, %c0_109, %c0_110, %c0_111], %77 {strides = array<i32>} : memref<1x1x128x128xf32, #tpu.memory_space<vmem>>, vector<1x1x128x128xf32>,
    return
  }
  func.func @transform_0(%arg0: i32, %arg1: i32) -> (i32, i32, i32, i32, i32) {
    %c0_i32 = arith.constant 0 : i32
    %c0_i32_0 = arith.constant 0 : i32
    %c0_i32_1 = arith.constant 0 : i32
    %c0_i32_2 = arith.constant 0 : i32
    return %arg0, %arg1, %c0_i32, %c0_i32_0, %c0_i32_1 : i32, i32, i32, i32, i32
  }
  func.func @transform_1(%arg0: i32, %arg1: i32) -> (i32, i32) {
    %c0_i32 = arith.constant 0 : i32
    %c0_i32_0 = arith.constant 0 : i32
    %c0_i32_1 = arith.constant 0 : i32
    return %c0_i32, %c0_i32_0 : i32, i32
  }
  func.func @transform_2(%arg0: i32, %arg1: i32) -> (i32, i32, i32, i32) {
    %c0_i32 = arith.constant 0 : i32
    %c0_i32_0 = arith.constant 0 : i32
    %c0_i32_1 = arith.constant 0 : i32
    return %arg0, %arg1, %c0_i32, %c0_i32_0 : i32, i32, i32, i32
  }
}

</mosaic_0001>

<bundles_post_ra>
// kernel: tpu_custom_call.1
= control target key start
LH: loop header
LB: loop body
LE: loop exit
PB: predicated region body
PF: predicated region fallthrough
CT: control target
= control target key end

     0   :  { %7 = vsyncpa [#allocation4], 0  ;;  %s4026_s0 = inlined_call_operand.vmem [shape: f32[2,2,12,20,8], index: 0, kind: input, shape index: {}]   ;;  %s4027_s1 = inlined_call_operand.vmem [shape: f32[144,128], index: 1, kind: input, shape index: {}]   ;;  %s4028_s2 = inlined_call_operand.hbm [shape: f32[2,2,128,128], index: 2, kind: output, shape index: {}]  }
   0x1   :  { %9 = vsyncpa [#allocation4 + $0x1], 0  ;;  %s2684_s9 = smov 0   ;;  %s2686_s10 = smov 0  }
   0x2   :  { %s2688_s11 = smov 0   ;;  %s2690_s12 = smov 0  }
   0x3   :  { %s2692_s13 = smov 0   ;;  %s2694_s14 = smov 0  }
   0x4   :  { %s2696_s15 = smov 0   ;;  %s2698_s16 = smov 0  }
   0x5 LB: > { %s2151_s17 = sadd.s32 4294967295, %s2649_s16   ;;  %s2152_s18 = sadd.s32 4294967294, %s2649_s16   ;;  %s2649_s16 = sphi %s2698_s16, %s15_s16   ;;  %s2645_s15 = sphi %s2696_s15, %s4037_s15   ;;  %s2641_s14 = sphi %s2694_s14, %s4036_s14   ;;  %s2637_s13 = sphi %s2692_s13, %s4035_s13   ;;  %s2633_s12 = sphi %s2690_s12, %s4034_s12   ;;  %s2629_s11 = sphi %s2688_s11, %s4033_s11   ;;  %s2625_s10 = sphi %s2686_s10, %s4032_s10   ;;  %s2621_s9 = sphi %s2684_s9, %s4031_s9  }
   0x6   : > { %s24_s19 = sadd.s32 1, %s2641_s14  ;;  %s27_s20 = sadd.s32 1, %s2645_s15 }
   0x7   : > { %p25_p0 = scmp.ge.s32.totalorder %s24_s19, 2  ;;  %p95_p1 = scmp.ne.s32.totalorder %s2629_s11, %s2625_s10 }
   0x8   : > { %p96_p2 = scmp.eq.s32.totalorder %s2151_s17, 3  ;;  %p101_p5 = scmp.ne.s32.totalorder %s2625_s10, %s2621_s9 }
   0x9   : > { %s4039_s19 = smov (%p25_p0, %s24_s19), 0  ;;  %s4041_s20 = smov (!%p25_p0, %s27_s20), %s2645_s15 }
   0xa   : > { %s81_s21 = ssub.s32 %s2641_s14, %s4039_s19  ;;  %p2735_p3 = por %p96_p2, %p95_p1 }
   0xb   : > { %p29_p4 = scmp.ge.s32.totalorder %s4041_s20, 2  ;;  %p102_p6 = scmp.eq.s32.totalorder %s2152_s18, 3 }
   0xc   : > { %p2155_p7 = scmp.ge.s32.totalorder %s2649_s16, 1  ;;  %p135_p9 = scmp.lt.s32.totalorder %s2649_s16, 5 }
   0xd   : > { %s4043_s20 = smov (%p29_p4, %s4041_s20), 0  ;;  %p2744_p8 = por %p102_p6, %p101_p5 }
   0xe   : > { %s80_s24 = ssub.s32 %s2645_s15, %s4043_s20  ;;  %s85_s25 = sadd.s32 1, %s2629_s11 }
   0xf   : > { %s82_s26 = sor.u32 %s81_s21, %s80_s24  ;;  %p136_p10 = pnand %p2155_p7, %p135_p9 }
  0x10   : > { %p83_p11 = scmp.eq.s32.totalorder %s82_s26, 0  ;;  %p161_p12 = scmp.lt.s32.totalorder (!%p136_p10), %s2637_s13, 1  ;;  %vm186_vm0 = vcmask (!%p136_p10), 64512   ;;  %vm283_vm1 = vcmask (!%p136_p10), 130112   ;;  %vm380_vm2 = vcmask (!%p136_p10), 195712   ;;  %vm478_vm3 = vcmask (!%p136_p10), 261312  }
  0x11   : > { %139 = sbr.rel (%p136_p10) target bundleno = 892 (0x37c), region = 28  ;;  %p163_p13 = scmp.lt.s32.totalorder (!%p136_p10), %s2633_s12, 1  ;;  %vm575_vm4 = vcmask (!%p136_p10), 326912   ;;  %vm672_vm5 = vcmask (!%p136_p10), 392512   ;;  %vm770_vm6 = vcmask (!%p136_p10), 458112   ;;  %vm867_vm7 = vcmask (!%p136_p10), 523712  }
  0x12   : > { %s2753_s27 = scalar_select %p83_p11, %s2629_s11, %s85_s25  }
  0x13   : > { %s2651_s17 = smov (!%p136_p10), 8   ;;  %s2652_s18 = smov (!%p136_p10), 16   ;;  %vm964_vm8 = vcmask (!%p136_p10), 589312   ;;  %vm1062_vm9 = vcmask (!%p136_p10), 654912   ;;  %vm1159_vm10 = vcmask (!%p136_p10), 720512   ;;  %vm1256_vm11 = vcmask (!%p136_p10), 786112  }
  0x14   : > { %s2653_s21 = smov (!%p136_p10), 24   ;;  %s2654_s24 = smov (!%p136_p10), 32   ;;  %vm1353_vm12 = vcmask (!%p136_p10), 851712   ;;  %vm1450_vm13 = vcmask (!%p136_p10), 917312   ;;  %vm1547_vm14 = vcmask (!%p136_p10), 982912   ;;  %vm1840_vm15 = vcmask (!%p136_p10), 130048  }
  0x15   : > { %s2655_s25 = smov (!%p136_p10), 40   ;;  %s2656_s26 = smov (!%p136_p10), 48  }
  0x16   : > { %s2667_s7 = smov (!%p136_p10), [#allocation3]  }
  0x18   : > { %s162_s28 = scalar_select %p161_p12, %s2637_s13, 1 }
  0x19   : > { %s164_s29 = scalar_select %p163_p13, %s2633_s12, 1 }
  0x1a   : > { %s2466_s30 = smul.u32 72, %s162_s28  ;;  %s2657_s28 = smov 56  }
  0x1b   : > { %s2465_s3 = smul.u32 36, %s164_s29  ;;  %s2658_s29 = smov 64  }
  0x1d   : > { %s167_s4 = sadd.s32 %s2466_s30, %s2465_s3  ;;  %s2659_s30 = smov 72  }
  0x1e   : > { %s2157_s5 = sshll.u32 %s167_s4, 3  ;;  %s2660_s3 = smov 80  }
  0x1f   : > { %s2762_s8 = scalar_lea.vmem %s4026_s0, %s2157_s5  ;;  %s2665_s5 = smov 112  }
  0x20   : > { %v2765_v0 = vld [vmem:[%s2762_s8 + $0x1a] sm:$0xff]  ;;  %v203_v1 = vld [vmem:[%s2762_s8 + $0x2] sm:$0xff]  ;;  %v204_v3 = vld [vmem:[%s2762_s8 + $0xa] sm:$0xff] }
  0x21   : > { %239 = vrot.lane.b32.xlu1 %v2765_v0, %s2651_s17  ;;  %235 = vrot.lane.b32.xlu0 %v203_v1, %s2651_s17  ;;  %v2772_v2 = vld [vmem:[%s2762_s8 + $0x22] sm:$0xff]  ;;  %v2779_v4 = vld [vmem:[%s2762_s8 + $0x3a] sm:$0xff] }
  0x22   : > { %v2782_v5 = vld [vmem:[%s2762_s8 + $0x32] sm:$0xff]  ;;  %v2792_v7 = vld [vmem:[%s2762_s8 + $0x4a] sm:$0xff]  ;;  %v2801_v10 = vld [vmem:[%s2762_s8 + $0x62] sm:$0xff] }
  0x23   : > { %v2789_v6 = vld [vmem:[%s2762_s8 + $0x52] sm:$0xff]  ;;  %v2798_v9 = vld [vmem:[%s2762_s8 + $0x6a] sm:$0xff]  ;;  %v2822_v15 = vld [vmem:[%s2762_s8 + $0x60] sm:$0xff] }
  0x24   : > { %v2795_v8 = vld [vmem:[%s2762_s8 + $0x38] sm:$0xff]  ;;  %v2804_v11 = vld [vmem:[%s2762_s8 + $0x30] sm:$0xff]  ;;  %v2810_v13 = vld [vmem:[%s2762_s8 + $0x48] sm:$0xff]  ;;  %195 = vst.msk [vmem:[#allocation2 + $0x80] sm:$0xff] %vm186_vm0, %v2822_v15 }
  0x25   : > { %241 = vrot.lane.b32.xlu1 %v2772_v2, %s2651_s17  ;;  %237 = vrot.lane.b32.xlu0 %v204_v3, %s2651_s17  ;;  %v2807_v12 = vld [vmem:[%s2762_s8 + $0x50] sm:$0xff]  ;;  %192 = vst.msk [vmem:[#allocation2 + $0x50] sm:$0xff] %vm186_vm0, %v2795_v8  ;;  %v2819_v14 = vld [vmem:[%s2762_s8 + $0x68] sm:$0xff]  ;;  %191 = vst.msk [vmem:[#allocation2 + $0x40] sm:$0xff] %vm186_vm0, %v2804_v11 }
  0x26   : > { %194 = vst.msk [vmem:[#allocation2 + $0x70] sm:$0xff] %vm186_vm0, %v2807_v12  ;;  %193 = vst.msk [vmem:[#allocation2 + $0x60] sm:$0xff] %vm186_vm0, %v2810_v13  ;;  %v2831_v16 = vld [vmem:[%s2762_s8 + $0x80] sm:$0xff]  ;;  %v2834_v17 = vld [vmem:[%s2762_s8 + $0x78] sm:$0xff] }
  0x27   : > { %v2837_v18 = vld [vmem:[%s2762_s8 + $0x98] sm:$0xff]  ;;  %196 = vst.msk [vmem:[#allocation2 + $0x90] sm:$0xff] %vm186_vm0, %v2819_v14  ;;  %v2844_v19 = vld [vmem:[%s2762_s8 + $0x90] sm:$0xff]  ;;  %v2850_v21 = vld [vmem:[%s2762_s8 + $0xa8] sm:$0xff] }
  0x28   : > { %v2847_v20 = vld [vmem:[%s2762_s8 + $0xb0] sm:$0xff]  ;;  %198 = vst.msk [vmem:[#allocation2 + $0xb0] sm:$0xff] %vm186_vm0, %v2831_v16  ;;  %197 = vst.msk [vmem:[#allocation2 + $0xa0] sm:$0xff] %vm186_vm0, %v2834_v17  ;;  %v2859_v22 = vld [vmem:[%s2762_s8 + $0x82] sm:$0xff] }
  0x29   : > { %245 = vrot.lane.b32.xlu1 %v2779_v4, %s2651_s17  ;;  %243 = vrot.lane.b32.xlu0 %v2782_v5, %s2651_s17  ;;  %200 = vst.msk [vmem:[#allocation2 + $0xd0] sm:$0xff] %vm186_vm0, %v2837_v18  ;;  %199 = vst.msk [vmem:[#allocation2 + $0xc0] sm:$0xff] %vm186_vm0, %v2844_v19  ;;  %v2872_v23 = vld [vmem:[%s2762_s8 + $0x7a] sm:$0xff]  ;;  %v171_v27 = vld [vmem:[%s2762_s8 + $0x8] sm:$0xff] }
  0x2a   : > { %202 = vst.msk [vmem:[#allocation2 + $0xf0] sm:$0xff] %vm186_vm0, %v2847_v20  ;;  %201 = vst.msk [vmem:[#allocation2 + $0xe0] sm:$0xff] %vm186_vm0, %v2850_v21  ;;  %v172_v24 = vld [vmem:[%s2762_s8 + $0x18] sm:$0xff]  ;;  %v170_v25 = vld [vmem:[%s2762_s8] sm:$0xff] }
  0x2b   : > { %189 = vst.msk [vmem:[#allocation2 + $0x20] sm:$0xff] %vm186_vm0, %v172_v24  ;;  %v173_v26 = vld [vmem:[%s2762_s8 + $0x20] sm:$0xff]  ;;  %187 = vst.msk [vmem:[#allocation2] sm:$0xff] %vm186_vm0, %v170_v25  ;;  %v2890_v29 = vld [vmem:[%s2762_s8 + $0x92] sm:$0xff] }
  0x2c   : > { %190 = vst.msk [vmem:[#allocation2 + $0x30] sm:$0xff] %vm186_vm0, %v173_v26  ;;  %188 = vst.msk [vmem:[#allocation2 + $0x10] sm:$0xff] %vm186_vm0, %v171_v27  ;;  %v2887_v28 = vld [vmem:[%s2762_s8 + $0x9a] sm:$0xff]  ;;  %v2897_v30 = vld [vmem:[%s2762_s8 + $0xb2] sm:$0xff] }
  0x2d   : > { %249 = vrot.lane.b32.xlu1 %v2789_v6, %s2651_s17  ;;  %247 = vrot.lane.b32.xlu0 %v2792_v7, %s2651_s17  ;;  %v2900_v31 = vld [vmem:[%s2762_s8 + $0xaa] sm:$0xff]  ;;  %v302_v35 = vld [vmem:[%s2762_s8 + $0x1c] sm:$0xff] }
  0x2e   : > { %v301_v32 = vld [vmem:[%s2762_s8 + $0xc] sm:$0xff]  ;;  %v300_v33 = vld [vmem:[%s2762_s8 + $0x4] sm:$0xff]  ;;  %v2911_v36 = vld [vmem:[%s2762_s8 + $0x3c] sm:$0xff] }
  0x2f   : > { %v303_v34 = vld [vmem:[%s2762_s8 + $0x24] sm:$0xff]  ;;  %v2914_v37 = vld [vmem:[%s2762_s8 + $0x34] sm:$0xff]  ;;  %v2922_v39 = vld [vmem:[%s2762_s8 + $0x4c] sm:$0xff] }
  0x30   : > { %v2919_v38 = vld [vmem:[%s2762_s8 + $0x54] sm:$0xff]  ;;  %v2927_v40 = vld [vmem:[%s2762_s8 + $0x6c] sm:$0xff]  ;;  %v2930_v41 = vld [vmem:[%s2762_s8 + $0x64] sm:$0xff] }
  0x31   : > { %253 = vrot.lane.b32.xlu1 %v2798_v9, %s2651_s17  ;;  %251 = vrot.lane.b32.xlu0 %v2801_v10, %s2651_s17  ;;  %v2935_v42 = vld [vmem:[%s2762_s8 + $0x84] sm:$0xff]  ;;  %v2938_v43 = vld [vmem:[%s2762_s8 + $0x7c] sm:$0xff] }
  0x32   : > { %v2943_v44 = vld [vmem:[%s2762_s8 + $0x9c] sm:$0xff]  ;;  %v2946_v45 = vld [vmem:[%s2762_s8 + $0x94] sm:$0xff]  ;;  %v2954_v47 = vld [vmem:[%s2762_s8 + $0xac] sm:$0xff] }
  0x33   : > { %v2951_v46 = vld [vmem:[%s2762_s8 + $0xb4] sm:$0xff]  ;;  %v2971_v48 = vld [vmem:[%s2762_s8 + $0xc8] sm:$0xff]  ;;  %v2974_v49 = vld [vmem:[%s2762_s8 + $0xc0] sm:$0xff] }
  0x34   : > { %v2979_v50 = vld [vmem:[%s2762_s8 + $0xe0] sm:$0xff]  ;;  %v2982_v51 = vld [vmem:[%s2762_s8 + $0xd8] sm:$0xff]  ;;  %v3013_v54 = vld [vmem:[%s2762_s8 + $0xca] sm:$0xff] }
  0x35   : > { %257 = vrot.lane.b32.xlu1 %v2859_v22, %s2651_s17  ;;  %255 = vrot.lane.b32.xlu0 %v2872_v23, %s2651_s17  ;;  %v3016_v55 = vld [vmem:[%s2762_s8 + $0xc2] sm:$0xff]  ;;  %v3028_v59 = vld [vmem:[%s2762_s8 + $0xda] sm:$0xff] }
  0x36   : > { %v3025_v58 = vld [vmem:[%s2762_s8 + $0xe2] sm:$0xff]  ;;  %v3073_v26 = vld [vmem:[%s2762_s8 + $0xcc] sm:$0xff] }
  0x37   : > { %v3076_v27 = vld [vmem:[%s2762_s8 + $0xc4] sm:$0xff] }
  0x39   : > { %261 = vrot.lane.b32.xlu1 %v2887_v28, %s2651_s17  ;;  %259 = vrot.lane.b32.xlu0 %v2890_v29, %s2651_s17 }
  0x3d   : > { %265 = vrot.lane.b32.xlu1 %v2897_v30, %s2651_s17  ;;  %263 = vrot.lane.b32.xlu0 %v2900_v31, %s2651_s17 }
  0x41   : > { %334 = vrot.lane.b32.xlu1 %v301_v32, %s2652_s18  ;;  %332 = vrot.lane.b32.xlu0 %v300_v33, %s2652_s18  ;;  %v3085_v32 = vld [vmem:[%s2762_s8 + $0xe4] sm:$0xff]  ;;  %v3088_v33 = vld [vmem:[%s2762_s8 + $0xdc] sm:$0xff] }
  0x45   : > { %338 = vrot.lane.b32.xlu1 %v303_v34, %s2652_s18  ;;  %336 = vrot.lane.b32.xlu0 %v302_v35, %s2652_s18 }
  0x49   : > { %342 = vrot.lane.b32.xlu1 %v2911_v36, %s2652_s18  ;;  %340 = vrot.lane.b32.xlu0 %v2914_v37, %s2652_s18 }
  0x4d   : > { %346 = vrot.lane.b32.xlu1 %v2919_v38, %s2652_s18  ;;  %344 = vrot.lane.b32.xlu0 %v2922_v39, %s2652_s18 }
  0x51   : > { %350 = vrot.lane.b32.xlu1 %v2927_v40, %s2652_s18  ;;  %348 = vrot.lane.b32.xlu0 %v2930_v41, %s2652_s18 }
  0x55   : > { %354 = vrot.lane.b32.xlu1 %v2935_v42, %s2652_s18  ;;  %352 = vrot.lane.b32.xlu0 %v2938_v43, %s2652_s18 }
  0x59   : > { %358 = vrot.lane.b32.xlu1 %v2943_v44, %s2652_s18  ;;  %356 = vrot.lane.b32.xlu0 %v2946_v45, %s2652_s18 }
  0x5d   : > { %362 = vrot.lane.b32.xlu1 %v2951_v46, %s2652_s18  ;;  %360 = vrot.lane.b32.xlu0 %v2954_v47, %s2652_s18  ;;  %s2662_s18 = smov 88  }
  0x61   : > { %432 = vrot.lane.b32.xlu1 %v2795_v8, %s2653_s21  ;;  %430 = vrot.lane.b32.xlu0 %v2804_v11, %s2653_s21 }
  0x65   : > { %436 = vrot.lane.b32.xlu1 %v2807_v12, %s2653_s21  ;;  %434 = vrot.lane.b32.xlu0 %v2810_v13, %s2653_s21 }
  0x69   : > { %440 = vrot.lane.b32.xlu1 %v2819_v14, %s2653_s21  ;;  %438 = vrot.lane.b32.xlu0 %v2822_v15, %s2653_s21 }
  0x6d   : > { %444 = vrot.lane.b32.xlu1 %v2831_v16, %s2653_s21  ;;  %442 = vrot.lane.b32.xlu0 %v2834_v17, %s2653_s21 }
  0x71   : > { %448 = vrot.lane.b32.xlu1 %v2837_v18, %s2653_s21  ;;  %446 = vrot.lane.b32.xlu0 %v2844_v19, %s2653_s21 }
  0x75   : > { %452 = vrot.lane.b32.xlu1 %v2847_v20, %s2653_s21  ;;  %450 = vrot.lane.b32.xlu0 %v2850_v21, %s2653_s21 }
  0x79   : > { %456 = vrot.lane.b32.xlu1 %v2971_v48, %s2653_s21  ;;  %454 = vrot.lane.b32.xlu0 %v2974_v49, %s2653_s21 }
  0x7d   : > { %460 = vrot.lane.b32.xlu1 %v2979_v50, %s2653_s21  ;;  %458 = vrot.lane.b32.xlu0 %v2982_v51, %s2653_s21  ;;  %s2663_s21 = smov 96  }
  0x81   : > { %529 = vrot.lane.b32.xlu1 %v2779_v4, %s2654_s24  ;;  %527 = vrot.lane.b32.xlu0 %v2782_v5, %s2654_s24 }
  0x85   : > { %533 = vrot.lane.b32.xlu1 %v2789_v6, %s2654_s24  ;;  %531 = vrot.lane.b32.xlu0 %v2792_v7, %s2654_s24 }
  0x89   : > { %537 = vrot.lane.b32.xlu1 %v2798_v9, %s2654_s24  ;;  %535 = vrot.lane.b32.xlu0 %v2801_v10, %s2654_s24 }
  0x8d   : > { %541 = vrot.lane.b32.xlu1 %v2859_v22, %s2654_s24  ;;  %539 = vrot.lane.b32.xlu0 %v2872_v23, %s2654_s24 }
  0x91   : > { %545 = vrot.lane.b32.xlu1 %v2887_v28, %s2654_s24  ;;  %543 = vrot.lane.b32.xlu0 %v2890_v29, %s2654_s24 }
  0x93   : > { %v240_v52 = vpop.permute.xlu1 %239  ;;  %v236_v53 = vpop.permute.xlu0 %235 }
  0x94   : > { %286 = vst.msk [vmem:[#allocation2 + $0x20] sm:$0xff] %vm283_vm1, %v240_v52  ;;  %284 = vst.msk [vmem:[#allocation2] sm:$0xff] %vm283_vm1, %v236_v53 }
  0x95   : > { %549 = vrot.lane.b32.xlu1 %v2897_v30, %s2654_s24  ;;  %547 = vrot.lane.b32.xlu0 %v2900_v31, %s2654_s24 }
  0x97   : > { %v242_v56 = vpop.permute.xlu1 %241  ;;  %v238_v57 = vpop.permute.xlu0 %237 }
  0x98   : > { %287 = vst.msk [vmem:[#allocation2 + $0x30] sm:$0xff] %vm283_vm1, %v242_v56  ;;  %285 = vst.msk [vmem:[#allocation2 + $0x10] sm:$0xff] %vm283_vm1, %v238_v57 }
  0x99   : > { %553 = vrot.lane.b32.xlu1 %v3013_v54, %s2654_s24  ;;  %551 = vrot.lane.b32.xlu0 %v3016_v55, %s2654_s24 }
  0x9b   : > { %v246_v60 = vpop.permute.xlu1 %245  ;;  %v244_v61 = vpop.permute.xlu0 %243 }
  0x9c   : > { %289 = vst.msk [vmem:[#allocation2 + $0x50] sm:$0xff] %vm283_vm1, %v246_v60  ;;  %288 = vst.msk [vmem:[#allocation2 + $0x40] sm:$0xff] %vm283_vm1, %v244_v61 }
  0x9d   : > { %557 = vrot.lane.b32.xlu1 %v3025_v58, %s2654_s24  ;;  %555 = vrot.lane.b32.xlu0 %v3028_v59, %s2654_s24  ;;  %s2559_s24 = sshll.u32 %s2667_s7, 4  ;;  %s2560_s24 = int_to_ptr.vmem [resolvable:$false] %s2559_s24 }
  0x9f   : > { %v250_v62 = vpop.permute.xlu1 %249  ;;  %v248_v63 = vpop.permute.xlu0 %247 }
  0xa0   : > { %291 = vst.msk [vmem:[#allocation2 + $0x70] sm:$0xff] %vm283_vm1, %v250_v62  ;;  %290 = vst.msk [vmem:[#allocation2 + $0x60] sm:$0xff] %vm283_vm1, %v248_v63 }
  0xa1   : > { %626 = vrot.lane.b32.xlu1 %v2911_v36, %s2655_s25  ;;  %624 = vrot.lane.b32.xlu0 %v2914_v37, %s2655_s25 }
  0xa3   : > { %v254_v1 = vpop.permute.xlu1 %253  ;;  %v252_v3 = vpop.permute.xlu0 %251 }
  0xa4   : > { %293 = vst.msk [vmem:[#allocation2 + $0x90] sm:$0xff] %vm283_vm1, %v254_v1  ;;  %292 = vst.msk [vmem:[#allocation2 + $0x80] sm:$0xff] %vm283_vm1, %v252_v3 }
  0xa5   : > { %630 = vrot.lane.b32.xlu1 %v2919_v38, %s2655_s25  ;;  %628 = vrot.lane.b32.xlu0 %v2922_v39, %s2655_s25 }
  0xa7   : > { %v258_v6 = vpop.permute.xlu1 %257  ;;  %v256_v7 = vpop.permute.xlu0 %255 }
  0xa8   : > { %295 = vst.msk [vmem:[#allocation2 + $0xb0] sm:$0xff] %vm283_vm1, %v258_v6  ;;  %294 = vst.msk [vmem:[#allocation2 + $0xa0] sm:$0xff] %vm283_vm1, %v256_v7  ;;  %v1822_v7 = vld [vmem:[%s4027_s1] sm:$0xff] }
  0xa9   : > { %634 = vrot.lane.b32.xlu1 %v2927_v40, %s2655_s25  ;;  %632 = vrot.lane.b32.xlu0 %v2930_v41, %s2655_s25 }
  0xab   : > { %v262_v8 = vpop.permute.xlu1 %261  ;;  %v260_v11 = vpop.permute.xlu0 %259 }
  0xac   : > { %297 = vst.msk [vmem:[#allocation2 + $0xd0] sm:$0xff] %vm283_vm1, %v262_v8  ;;  %296 = vst.msk [vmem:[#allocation2 + $0xc0] sm:$0xff] %vm283_vm1, %v260_v11  ;;  %v1823_v8 = vld [vmem:[%s4027_s1 + $0x8] sm:$0xff] }
  0xad   : > { %638 = vrot.lane.b32.xlu1 %v2935_v42, %s2655_s25  ;;  %636 = vrot.lane.b32.xlu0 %v2938_v43, %s2655_s25 }
  0xaf   : > { %v266_v12 = vpop.permute.xlu1 %265  ;;  %v264_v13 = vpop.permute.xlu0 %263 }
  0xb0   : > { %299 = vst.msk [vmem:[#allocation2 + $0xf0] sm:$0xff] %vm283_vm1, %v266_v12  ;;  %298 = vst.msk [vmem:[#allocation2 + $0xe0] sm:$0xff] %vm283_vm1, %v264_v13  ;;  %v2421_v13 = vpack.c.bf16 %v1823_v8, %v1822_v7  ;;  %v3330_v8 = vld [vmem:[%s2762_s8 + $0xab] sm:$0xff] }
  0xb1   : > { %642 = vrot.lane.b32.xlu1 %v2943_v44, %s2655_s25  ;;  %640 = vrot.lane.b32.xlu0 %v2946_v45, %s2655_s25 }
  0xb3   : > { %v335_v24 = vpop.permute.xlu1 %334  ;;  %v333_v25 = vpop.permute.xlu0 %332 }
  0xb4   : > { %382 = vst.msk [vmem:[#allocation2 + $0x10] sm:$0xff] %vm380_vm2, %v335_v24  ;;  %381 = vst.msk [vmem:[#allocation2] sm:$0xff] %vm380_vm2, %v333_v25  ;;  %v1824_v24 = vld [vmem:[%s4027_s1 + $0x10] sm:$0xff]  ;;  %v1825_v25 = vld [vmem:[%s4027_s1 + $0x18] sm:$0xff] }
  0xb5   : > { %646 = vrot.lane.b32.xlu1 %v2951_v46, %s2655_s25  ;;  %644 = vrot.lane.b32.xlu0 %v2954_v47, %s2655_s25  ;;  %v2219_v46 = vld [vmem:[%s2762_s8 + $0xf8] sm:$0xff]  ;;  %v2218_v47 = vld [vmem:[%s2762_s8 + $0xf0] sm:$0xff] }
  0xb7   : > { %v339_v30 = vpop.permute.xlu1 %338  ;;  %v337_v31 = vpop.permute.xlu0 %336 }
  0xb8   : > { %384 = vst.msk [vmem:[#allocation2 + $0x30] sm:$0xff] %vm380_vm2, %v339_v30  ;;  %383 = vst.msk [vmem:[#allocation2 + $0x20] sm:$0xff] %vm380_vm2, %v337_v31  ;;  %v2424_v31 = vpack.c.bf16 %v1825_v25, %v1824_v24 }
  0xb9   : > { %650 = vrot.lane.b32.xlu1 %v3073_v26, %s2655_s25  ;;  %648 = vrot.lane.b32.xlu0 %v3076_v27, %s2655_s25 }
  0xbb   : > { %v343_v34 = vpop.permute.xlu1 %342  ;;  %v341_v35 = vpop.permute.xlu0 %340 }
  0xbc   : > { %386 = vst.msk [vmem:[#allocation2 + $0x50] sm:$0xff] %vm380_vm2, %v343_v34  ;;  %385 = vst.msk [vmem:[#allocation2 + $0x40] sm:$0xff] %vm380_vm2, %v341_v35  ;;  %v1826_v34 = vld [vmem:[%s4027_s1 + $0x20] sm:$0xff]  ;;  %v1827_v35 = vld [vmem:[%s4027_s1 + $0x28] sm:$0xff] }
  0xbd   : > { %654 = vrot.lane.b32.xlu1 %v3085_v32, %s2655_s25  ;;  %652 = vrot.lane.b32.xlu0 %v3088_v33, %s2655_s25  ;;  %s2664_s25 = smov 104  }
  0xbf   : > { %v347_v36 = vpop.permute.xlu1 %346  ;;  %v345_v37 = vpop.permute.xlu0 %344 }
  0xc0   : > { %388 = vst.msk [vmem:[#allocation2 + $0x70] sm:$0xff] %vm380_vm2, %v347_v36  ;;  %387 = vst.msk [vmem:[#allocation2 + $0x60] sm:$0xff] %vm380_vm2, %v345_v37 }
  0xc1   : > { %724 = vrot.lane.b32.xlu1 %v2819_v14, %s2656_s26  ;;  %722 = vrot.lane.b32.xlu0 %v2822_v15, %s2656_s26 }
  0xc3   : > { %v351_v38 = vpop.permute.xlu1 %350  ;;  %v349_v39 = vpop.permute.xlu0 %348 }
  0xc4   : > { %390 = vst.msk [vmem:[#allocation2 + $0x90] sm:$0xff] %vm380_vm2, %v351_v38  ;;  %389 = vst.msk [vmem:[#allocation2 + $0x80] sm:$0xff] %vm380_vm2, %v349_v39  ;;  %v3229_v38 = vld [vmem:[%s2762_s8 + $0xb2] sm:$0xff] }
  0xc5   : > { %728 = vrot.lane.b32.xlu1 %v2831_v16, %s2656_s26  ;;  %726 = vrot.lane.b32.xlu0 %v2834_v17, %s2656_s26  ;;  %v3232_v39 = vld [vmem:[%s2762_s8 + $0x52] sm:$0xff]  ;;  %1687 = vst.msk [vmem:[#allocation2 + $0x98] sm:$0xff] %vm186_vm0, %v3229_v38 }
  0xc6   : > { %1679 = vst.msk [vmem:[#allocation2 + $0x18] sm:$0xff] %vm186_vm0, %v3232_v39 }
  0xc7   : > { %v355_v44 = vpop.permute.xlu1 %354  ;;  %v353_v45 = vpop.permute.xlu0 %352 }
  0xc8   : > { %392 = vst.msk [vmem:[#allocation2 + $0xb0] sm:$0xff] %vm380_vm2, %v355_v44  ;;  %391 = vst.msk [vmem:[#allocation2 + $0xa0] sm:$0xff] %vm380_vm2, %v353_v45  ;;  %v2255_v44 = vld [vmem:[%s2762_s8 + $0x21] sm:$0xff]  ;;  %v3244_v45 = vld [vmem:[%s2762_s8 + $0x91] sm:$0xff] }
  0xc9   : > { %732 = vrot.lane.b32.xlu1 %v2837_v18, %s2656_s26  ;;  %730 = vrot.lane.b32.xlu0 %v2844_v19, %s2656_s26 }
  0xcb   : > { %v359_v14 = vpop.permute.xlu1 %358  ;;  %v357_v15 = vpop.permute.xlu0 %356 }
  0xcc   : > { %394 = vst.msk [vmem:[#allocation2 + $0xd0] sm:$0xff] %vm380_vm2, %v359_v14  ;;  %393 = vst.msk [vmem:[#allocation2 + $0xc0] sm:$0xff] %vm380_vm2, %v357_v15  ;;  %v1828_v14 = vld [vmem:[%s4027_s1 + $0x30] sm:$0xff] }
  0xcd   : > { %736 = vrot.lane.b32.xlu1 %v2847_v20, %s2656_s26  ;;  %734 = vrot.lane.b32.xlu0 %v2850_v21, %s2656_s26  ;;  %v3129_v20 = vld [vmem:[%s2762_s8 + $0xaa] sm:$0xff] }
  0xce   : > { %v3132_v21 = vld [vmem:[%s2762_s8 + $0x4a] sm:$0xff]  ;;  %1686 = vst.msk [vmem:[#allocation2 + $0x88] sm:$0xff] %vm186_vm0, %v3129_v20 }
  0xcf   : > { %v363_v16 = vpop.permute.xlu1 %362  ;;  %v361_v17 = vpop.permute.xlu0 %360  ;;  %1678 = vst.msk [vmem:[#allocation2 + $0x8] sm:$0xff] %vm186_vm0, %v3132_v21 }
  0xd0   : > { %396 = vst.msk [vmem:[#allocation2 + $0xf0] sm:$0xff] %vm380_vm2, %v363_v16  ;;  %395 = vst.msk [vmem:[#allocation2 + $0xe0] sm:$0xff] %vm380_vm2, %v361_v17  ;;  %vm1645_vm2 = vcmask 1048512  }
  0xd1   : > { %740 = vrot.lane.b32.xlu1 %v2971_v48, %s2656_s26  ;;  %738 = vrot.lane.b32.xlu0 %v2974_v49, %s2656_s26 }
  0xd3   : > { %v433_v18 = vpop.permute.xlu1 %432  ;;  %v431_v19 = vpop.permute.xlu0 %430 }
  0xd4   : > { %480 = vst.msk [vmem:[#allocation2 + $0x10] sm:$0xff] %vm478_vm3, %v433_v18  ;;  %479 = vst.msk [vmem:[#allocation2] sm:$0xff] %vm478_vm3, %v431_v19  ;;  %v2263_v18 = vld [vmem:[%s2762_s8 + $0x81] sm:$0xff] }
  0xd5   : > { %744 = vrot.lane.b32.xlu1 %v2979_v50, %s2656_s26  ;;  %742 = vrot.lane.b32.xlu0 %v2982_v51, %s2656_s26  ;;  %v2221_v50 = vld [vmem:[%s2762_s8 + $0x110] sm:$0xff]  ;;  %v2220_v51 = vld [vmem:[%s2762_s8 + $0x108] sm:$0xff] }
  0xd6   : > { %v1830_v19 = vld [vmem:[%s4027_s1 + $0x40] sm:$0xff] }
  0xd7   : > { %v437_v48 = vpop.permute.xlu1 %436  ;;  %v435_v49 = vpop.permute.xlu0 %434 }
  0xd8   : > { %482 = vst.msk [vmem:[#allocation2 + $0x30] sm:$0xff] %vm478_vm3, %v437_v48  ;;  %481 = vst.msk [vmem:[#allocation2 + $0x20] sm:$0xff] %vm478_vm3, %v435_v49 }
  0xd9   : > { %748 = vrot.lane.b32.xlu1 %v2219_v46, %s2656_s26  ;;  %746 = vrot.lane.b32.xlu0 %v2218_v47, %s2656_s26  ;;  %v1831_v46 = vld [vmem:[%s4027_s1 + $0x48] sm:$0xff] }
  0xda   : > { %v2433_v49 = vpack.c.bf16 %v1831_v46, %v1830_v19 }
  0xdb   : > { %v441_v52 = vpop.permute.xlu1 %440  ;;  %v439_v53 = vpop.permute.xlu0 %438 }
  0xdc   : > { %484 = vst.msk [vmem:[#allocation2 + $0x50] sm:$0xff] %vm478_vm3, %v441_v52  ;;  %483 = vst.msk [vmem:[#allocation2 + $0x40] sm:$0xff] %vm478_vm3, %v439_v53 }
  0xdd   : > { %752 = vrot.lane.b32.xlu1 %v2221_v50, %s2656_s26  ;;  %750 = vrot.lane.b32.xlu0 %v2220_v51, %s2656_s26  ;;  %v1832_v50 = vld [vmem:[%s4027_s1 + $0x50] sm:$0xff]  ;;  %v1833_v51 = vld [vmem:[%s4027_s1 + $0x58] sm:$0xff]  ;;  %s2666_s26 = smov 120  }
  0xdf   : > { %v445_v56 = vpop.permute.xlu1 %444  ;;  %v443_v57 = vpop.permute.xlu0 %442 }
  0xe0   : > { %486 = vst.msk [vmem:[#allocation2 + $0x70] sm:$0xff] %vm478_vm3, %v445_v56  ;;  %485 = vst.msk [vmem:[#allocation2 + $0x60] sm:$0xff] %vm478_vm3, %v443_v57  ;;  %v2436_v56 = vpack.c.bf16 %v1833_v51, %v1832_v50  ;;  %v3288_v57 = vld [vmem:[%s2762_s8 + $0x33] sm:$0xff] }
  0xe1   : > { %821 = vrot.lane.b32.xlu1 %v2798_v9, %s2657_s28  ;;  %819 = vrot.lane.b32.xlu0 %v2801_v10, %s2657_s28  ;;  %v2262_v9 = vld [vmem:[%s2762_s8 + $0x79] sm:$0xff] }
  0xe2   : > { %v2254_v10 = vld [vmem:[%s2762_s8 + $0x19] sm:$0xff] }
  0xe3   : > { %v449_v60 = vpop.permute.xlu1 %448  ;;  %v447_v61 = vpop.permute.xlu0 %446 }
  0xe4   : > { %488 = vst.msk [vmem:[#allocation2 + $0x90] sm:$0xff] %vm478_vm3, %v449_v60  ;;  %487 = vst.msk [vmem:[#allocation2 + $0x80] sm:$0xff] %vm478_vm3, %v447_v61  ;;  %v1834_v60 = vld [vmem:[%s4027_s1 + $0x60] sm:$0xff]  ;;  %v1835_v61 = vld [vmem:[%s4027_s1 + $0x68] sm:$0xff] }
  0xe5   : > { %835 = vrot.lane.b32.xlu1 %v3016_v55, %s2657_s28  ;;  %823 = vrot.lane.b32.xlu0 %v2872_v23, %s2657_s28 }
  0xe7   : > { %v453_v62 = vpop.permute.xlu1 %452  ;;  %v451_v63 = vpop.permute.xlu0 %450 }
  0xe8   : > { %490 = vst.msk [vmem:[#allocation2 + $0xb0] sm:$0xff] %vm478_vm3, %v453_v62  ;;  %489 = vst.msk [vmem:[#allocation2 + $0xa0] sm:$0xff] %vm478_vm3, %v451_v63 }
  0xe9   : > { %932 = vrot.lane.b32.xlu1 %v3076_v27, %s2658_s29  ;;  %916 = vrot.lane.b32.xlu0 %v2930_v41, %s2658_s29  ;;  %v2286_v41 = vld [vmem:[%s2762_s8 + $0x1b] sm:$0xff] }
  0xeb   : > { %v457_v55 = vpop.permute.xlu1 %456  ;;  %v455_v1 = vpop.permute.xlu0 %454 }
  0xec   : > { %492 = vst.msk [vmem:[#allocation2 + $0xd0] sm:$0xff] %vm478_vm3, %v457_v55  ;;  %491 = vst.msk [vmem:[#allocation2 + $0xc0] sm:$0xff] %vm478_vm3, %v455_v1  ;;  %v3313_v55 = vld [vmem:[%s2762_s8 + $0x93] sm:$0xff] }
  0xed   : > { %1030 = vrot.lane.b32.xlu1 %v2262_v9, %s2659_s30  ;;  %1014 = vrot.lane.b32.xlu0 %v2254_v10, %s2659_s30  ;;  %v3301_v9 = vld [vmem:[%s2762_s8 + $0xfa] sm:$0xff]  ;;  %v3308_v10 = vld [vmem:[%s2762_s8 + $0x4b] sm:$0xff] }
  0xee   : > { %1693 = vst.msk [vmem:[#allocation2 + $0xf8] sm:$0xff] %vm186_vm0, %v3301_v9  ;;  %v1836_v1 = vld [vmem:[%s4027_s1 + $0x70] sm:$0xff] }
  0xef   : > { %v461_v3 = vpop.permute.xlu1 %460  ;;  %v459_v6 = vpop.permute.xlu0 %458 }
  0xf0   : > { %494 = vst.msk [vmem:[#allocation2 + $0xf0] sm:$0xff] %vm478_vm3, %v461_v3  ;;  %493 = vst.msk [vmem:[#allocation2 + $0xe0] sm:$0xff] %vm478_vm3, %v459_v6  ;;  %v1837_v3 = vld [vmem:[%s4027_s1 + $0x78] sm:$0xff] }
  0xf1   : > { %1127 = vrot.lane.b32.xlu1 %v2872_v23, %s2660_s3  ;;  %1111 = vrot.lane.b32.xlu0 %v2765_v0, %s2660_s3  ;;  %v2661_v23 = vmov 0.0|0.0   ;;  %v3199_v0 = vld [vmem:[%s2762_s8 + $0x7b] sm:$0xff]  ;;  %v2442_v7 = vpack.c.bf16 %v1837_v3, %v1836_v1 }
  0xf2   : > { %2420 = vmatprep.subr.bf16.mxu0 %v2661_v23  ;;  %2447 = vmatprep.subr.bf16.mxu1 %v2661_v23 }
  0xf3   : > { %v530_v11 = vpop.permute.xlu1 %529  ;;  %v528_v12 = vpop.permute.xlu0 %527  ;;  %2422 = vmatpush1.bf16.msra.mxu0 %v2421_v13  ;;  %2456 = vmatpush1.bf16.msra.mxu1 %v2421_v13 }
  0xf4   : > { %577 = vst.msk [vmem:[#allocation2 + $0x10] sm:$0xff] %vm575_vm4, %v530_v11  ;;  %576 = vst.msk [vmem:[#allocation2] sm:$0xff] %vm575_vm4, %v528_v12  ;;  %2423 = vmatprep.subr.bf16.mxu0 %v2661_v23  ;;  %2448 = vmatprep.subr.bf16.mxu1 %v2661_v23  ;;  %v1838_v11 = vld [vmem:[%s4027_s1 + $0x80] sm:$0xff]  ;;  %v1839_v12 = vld [vmem:[%s4027_s1 + $0x88] sm:$0xff] }
  0xf5   : > { %1208 = vrot.lane.b32.xlu1 %v2286_v41, %s2662_s18  ;;  %837 = vrot.lane.b32.xlu0 %v3013_v54, %s2657_s28  ;;  %v3216_v54 = vld [vmem:[%s2762_s8 + $0x31] sm:$0xff]  ;;  %v2445_v25 = vpack.c.bf16 %v1839_v12, %v1838_v11 }
  0xf7   : > { %v534_v27 = vpop.permute.xlu1 %533  ;;  %v532_v30 = vpop.permute.xlu0 %531  ;;  %2425 = vmatpush1.bf16.msra.mxu0 %v2424_v31  ;;  %2457 = vmatpush1.bf16.msra.mxu1 %v2424_v31 }
  0xf8   : > { %579 = vst.msk [vmem:[#allocation2 + $0x30] sm:$0xff] %vm575_vm4, %v534_v27  ;;  %578 = vst.msk [vmem:[#allocation2 + $0x20] sm:$0xff] %vm575_vm4, %v532_v30  ;;  %2426 = vmatprep.subr.bf16.mxu0 %v2661_v23  ;;  %2449 = vmatprep.subr.bf16.mxu1 %v2661_v23  ;;  %v3347_v27 = vld [vmem:[%s2762_s8 + $0x83] sm:$0xff] }
  0xf9   : > { %918 = vrot.lane.b32.xlu1 %v2927_v40, %s2658_s29  ;;  %1224 = vrot.lane.b32.xlu0 %v3199_v0, %s2662_s18  ;;  %v2427_v40 = vpack.c.bf16 %v1827_v35, %v1826_v34  ;;  %v2287_v30 = vld [vmem:[%s2762_s8 + $0x23] sm:$0xff] }
  0xfa   : > { %v3359_v34 = vld [vmem:[%s2762_s8 + $0x49] sm:$0xff] }
  0xfb   : > { %v538_v36 = vpop.permute.xlu1 %537  ;;  %v536_v37 = vpop.permute.xlu0 %535  ;;  %2428 = vmatpush1.bf16.msra.mxu0 %v2427_v40  ;;  %2458 = vmatpush1.bf16.msra.mxu1 %v2427_v40 }
  0xfc   : > { %581 = vst.msk [vmem:[#allocation2 + $0x50] sm:$0xff] %vm575_vm4, %v538_v36  ;;  %580 = vst.msk [vmem:[#allocation2 + $0x40] sm:$0xff] %vm575_vm4, %v536_v37  ;;  %2429 = vmatprep.subr.bf16.mxu0 %v2661_v23  ;;  %2450 = vmatprep.subr.bf16.mxu1 %v2661_v23 }
  0xfd   : > { %1305 = vrot.lane.b32.xlu1 %v3216_v54, %s2663_s21  ;;  %934 = vrot.lane.b32.xlu0 %v3073_v26, %s2658_s29  ;;  %v1829_v26 = vld [vmem:[%s4027_s1 + $0x38] sm:$0xff] }
  0xfe   : > { %v2430_v17 = vpack.c.bf16 %v1829_v26, %v1828_v14  ;;  %v3377_v14 = vld [vmem:[%s2762_s8 + $0x39] sm:$0xff] }
  0xff   : > { %v542_v15 = vpop.permute.xlu1 %541  ;;  %v540_v16 = vpop.permute.xlu0 %539 }
 0x100   : > { %583 = vst.msk [vmem:[#allocation2 + $0x70] sm:$0xff] %vm575_vm4, %v542_v15  ;;  %582 = vst.msk [vmem:[#allocation2 + $0x60] sm:$0xff] %vm575_vm4, %v540_v16  ;;  %2431 = vmatpush1.bf16.msra.mxu0 %v2430_v17  ;;  %2459 = vmatpush1.bf16.msra.mxu1 %v2430_v17  ;;  %v3382_v16 = vld [vmem:[%s2762_s8 + $0xc2] sm:$0xff] }
 0x101   : > { %1016 = vrot.lane.b32.xlu1 %v2255_v44, %s2659_s30  ;;  %1321 = vrot.lane.b32.xlu0 %v3244_v45, %s2663_s21  ;;  %v3374_v44 = vld [vmem:[%s2762_s8 + $0x99] sm:$0xff]  ;;  %v3385_v17 = vld [vmem:[%s2762_s8 + $0x62] sm:$0xff]  ;;  %1688 = vst.msk [vmem:[#allocation2 + $0xa8] sm:$0xff] %vm186_vm0, %v3382_v16 }
 0x102   : > { %2432 = vmatprep.subr.bf16.mxu0 %v2661_v23  ;;  %2451 = vmatprep.subr.bf16.mxu1 %v2661_v23  ;;  %1680 = vst.msk [vmem:[#allocation2 + $0x28] sm:$0xff] %vm186_vm0, %v3385_v17 }
 0x103   : > { %v546_v47 = vpop.permute.xlu1 %545  ;;  %v544_v48 = vpop.permute.xlu0 %543 }
 0x104   : > { %585 = vst.msk [vmem:[#allocation2 + $0x90] sm:$0xff] %vm575_vm4, %v546_v47  ;;  %584 = vst.msk [vmem:[#allocation2 + $0x80] sm:$0xff] %vm575_vm4, %v544_v48  ;;  %2434 = vmatpush1.bf16.msra.mxu0 %v2433_v49  ;;  %2460 = vmatpush1.bf16.msra.mxu1 %v2433_v49 }
 0x105   : > { %1402 = vrot.lane.b32.xlu1 %v2782_v5, %s2664_s25  ;;  %1032 = vrot.lane.b32.xlu0 %v2263_v18, %s2659_s30 }
 0x106   : > { %2435 = vmatprep.subr.bf16.mxu0 %v2661_v23  ;;  %2452 = vmatprep.subr.bf16.mxu1 %v2661_v23 }
 0x107   : > { %v550_v52 = vpop.permute.xlu1 %549  ;;  %v548_v53 = vpop.permute.xlu0 %547 }
 0x108   : > { %587 = vst.msk [vmem:[#allocation2 + $0xb0] sm:$0xff] %vm575_vm4, %v550_v52  ;;  %586 = vst.msk [vmem:[#allocation2 + $0xa0] sm:$0xff] %vm575_vm4, %v548_v53  ;;  %2437 = vmatpush1.bf16.msra.mxu0 %v2436_v56  ;;  %2461 = vmatpush1.bf16.msra.mxu1 %v2436_v56  ;;  %v3450_v56 = vld [vmem:[%s2762_s8 + $0xb1] sm:$0xff] }
 0x109   : > { %1113 = vrot.lane.b32.xlu1 %v2772_v2, %s2660_s3  ;;  %1418 = vrot.lane.b32.xlu0 %v2890_v29, %s2664_s25  ;;  %v2439_v2 = vpack.c.bf16 %v1835_v61, %v1834_v60  ;;  %v3453_v60 = vld [vmem:[%s2762_s8 + $0x51] sm:$0xff] }
 0x10a   : > { %2438 = vmatprep.subr.bf16.mxu0 %v2661_v23  ;;  %2453 = vmatprep.subr.bf16.mxu1 %v2661_v23 }
 0x10b   : > { %v554_v62 = vpop.permute.xlu1 %553  ;;  %v552_v63 = vpop.permute.xlu0 %551 }
 0x10c   : > { %589 = vst.msk [vmem:[#allocation2 + $0xd0] sm:$0xff] %vm575_vm4, %v554_v62  ;;  %588 = vst.msk [vmem:[#allocation2 + $0xc0] sm:$0xff] %vm575_vm4, %v552_v63  ;;  %2440 = vmatpush1.bf16.msra.mxu0 %v2439_v2  ;;  %2462 = vmatpush1.bf16.msra.mxu1 %v2439_v2  ;;  %v3470_v2 = vld [vmem:[%s2762_s8 + $0xca] sm:$0xff] }
 0x10d   : > { %1499 = vrot.lane.b32.xlu1 %v3288_v57, %s2665_s5  ;;  %1129 = vrot.lane.b32.xlu0 %v2859_v22, %s2660_s3  ;;  %1689 = vst.msk [vmem:[#allocation2 + $0xb8] sm:$0xff] %vm186_vm0, %v3470_v2 }
 0x10e   : > { %2441 = vmatprep.subr.bf16.mxu0 %v2661_v23  ;;  %2454 = vmatprep.subr.bf16.mxu1 %v2661_v23 }
 0x10f   : > { %v558_v6 = vpop.permute.xlu1 %557  ;;  %v556_v41 = vpop.permute.xlu0 %555 }
 0x110   : > { %591 = vst.msk [vmem:[#allocation2 + $0xf0] sm:$0xff] %vm575_vm4, %v558_v6  ;;  %590 = vst.msk [vmem:[#allocation2 + $0xe0] sm:$0xff] %vm575_vm4, %v556_v41  ;;  %2443 = vmatpush1.bf16.msra.mxu0 %v2442_v7  ;;  %2463 = vmatpush1.bf16.msra.mxu1 %v2442_v7  ;;  %v3496_v6 = vld [vmem:[%s2762_s8 + $0x9a] sm:$0xff] }
 0x111   : > { %1726 = vrot.lane.b32.xlu1 %v3308_v10, %s2651_s17  ;;  %1515 = vrot.lane.b32.xlu0 %v3313_v55, %s2665_s5  ;;  %v2273_v41 = vld [vmem:[%s2762_s8 + $0x3a] sm:$0xff] }
 0x112   : > { %2444 = vmatprep.subr.bf16.mxu0 %v2661_v23  ;;  %2455 = vmatprep.subr.bf16.mxu1 %v2661_v23 }
 0x113   : > { %v627_v13 = vpop.permute.xlu1 %626  ;;  %v625_v24 = vpop.permute.xlu0 %624 }
 0x114   : > { %674 = vst.msk [vmem:[#allocation2 + $0x10] sm:$0xff] %vm672_vm5, %v627_v13  ;;  %673 = vst.msk [vmem:[#allocation2] sm:$0xff] %vm672_vm5, %v625_v24  ;;  %2446 = vmatpush1.bf16.msra.mxu0 %v2445_v25  ;;  %2464 = vmatpush1.bf16.msra.mxu1 %v2445_v25  ;;  %v3511_v24 = vld [vmem:[%s2762_s8 + $0xc3] sm:$0xff] }
 0x115   : > { %839 = vrot.lane.b32.xlu1 %v3028_v59, %s2657_s28  ;;  %1742 = vrot.lane.b32.xlu0 %v3330_v8, %s2651_s17  ;;  %v3356_v59 = vld [vmem:[%s2762_s8 + $0xa9] sm:$0xff] }
 0x116   : > { %v3514_v25 = vld [vmem:[%s2762_s8 + $0x63] sm:$0xff] }
 0x117   : > { %v631_v31 = vpop.permute.xlu1 %630  ;;  %v629_v23 = vpop.permute.xlu0 %628 }
 0x118   : > { %676 = vst.msk [vmem:[#allocation2 + $0x30] sm:$0xff] %vm672_vm5, %v631_v31  ;;  %675 = vst.msk [vmem:[#allocation2 + $0x20] sm:$0xff] %vm672_vm5, %v629_v23  ;;  %v2234_v23 = vld [vmem:[%s2762_s8 + $0xf2] sm:$0xff] }
 0x119   : > { %1226 = vrot.lane.b32.xlu1 %v3347_v27, %s2662_s18  ;;  %1210 = vrot.lane.b32.xlu0 %v2287_v30, %s2662_s18 }
 0x11b   : > { %v635_v35 = vpop.permute.xlu1 %634  ;;  %v633_v36 = vpop.permute.xlu0 %632 }
 0x11c   : > { %678 = vst.msk [vmem:[#allocation2 + $0x50] sm:$0xff] %vm672_vm5, %v635_v35  ;;  %677 = vst.msk [vmem:[#allocation2 + $0x40] sm:$0xff] %vm672_vm5, %v633_v36  ;;  %v2226_v35 = vld [vmem:[%s2762_s8 + $0x92] sm:$0xff] }
 0x11d   : > { %1613 = vrot.lane.b32.xlu1 %v3356_v59, %s2666_s26  ;;  %1597 = vrot.lane.b32.xlu0 %v3359_v34, %s2666_s26 }
 0x11f   : > { %v639_v37 = vpop.permute.xlu1 %638  ;;  %v637_v40 = vpop.permute.xlu0 %636 }
 0x120   : > { %680 = vst.msk [vmem:[#allocation2 + $0x70] sm:$0xff] %vm672_vm5, %v639_v37  ;;  %679 = vst.msk [vmem:[#allocation2 + $0x60] sm:$0xff] %vm672_vm5, %v637_v40 }
 0x121   : > { %936 = vrot.lane.b32.xlu1 %v3088_v33, %s2658_s29  ;;  %920 = vrot.lane.b32.xlu0 %v2938_v43, %s2658_s29 }
 0x123   : > { %v643_v26 = vpop.permute.xlu1 %642  ;;  %v641_v15 = vpop.permute.xlu0 %640 }
 0x124   : > { %682 = vst.msk [vmem:[#allocation2 + $0x90] sm:$0xff] %vm672_vm5, %v643_v26  ;;  %681 = vst.msk [vmem:[#allocation2 + $0x80] sm:$0xff] %vm672_vm5, %v641_v15  ;;  %v3538_v26 = vld [vmem:[%s2762_s8 + $0x61] sm:$0xff] }
 0x125   : > { %1323 = vrot.lane.b32.xlu1 %v3374_v44, %s2663_s21  ;;  %1307 = vrot.lane.b32.xlu0 %v3377_v14, %s2663_s21 }
 0x127   : > { %v647_v43 = vpop.permute.xlu1 %646  ;;  %v645_v33 = vpop.permute.xlu0 %644 }
 0x128   : > { %684 = vst.msk [vmem:[#allocation2 + $0xb0] sm:$0xff] %vm672_vm5, %v647_v43  ;;  %683 = vst.msk [vmem:[#allocation2 + $0xa0] sm:$0xff] %vm672_vm5, %v645_v33  ;;  %v2250_v33 = vld [vmem:[%s2762_s8 + $0xf4] sm:$0xff] }
 0x129   : > { %1034 = vrot.lane.b32.xlu1 %v3244_v45, %s2659_s30  ;;  %1018 = vrot.lane.b32.xlu0 %v3216_v54, %s2659_s30  ;;  %v3414_v54 = vld [vmem:[%s2762_s8 + $0x9b] sm:$0xff] }
 0x12b   : > { %v651_v18 = vpop.permute.xlu1 %650  ;;  %v649_v19 = vpop.permute.xlu0 %648 }
 0x12c   : > { %686 = vst.msk [vmem:[#allocation2 + $0xd0] sm:$0xff] %vm672_vm5, %v651_v18  ;;  %685 = vst.msk [vmem:[#allocation2 + $0xc0] sm:$0xff] %vm672_vm5, %v649_v19  ;;  %v2242_v18 = vld [vmem:[%s2762_s8 + $0x94] sm:$0xff] }
 0x12d   : > { %1420 = vrot.lane.b32.xlu1 %v2887_v28, %s2664_s25  ;;  %1404 = vrot.lane.b32.xlu0 %v2779_v4, %s2664_s25  ;;  %v3417_v28 = vld [vmem:[%s2762_s8 + $0x3b] sm:$0xff] }
 0x12f   : > { %v655_v46 = vpop.permute.xlu1 %654  ;;  %v653_v45 = vpop.permute.xlu0 %652 }
 0x130   : > { %688 = vst.msk [vmem:[#allocation2 + $0xf0] sm:$0xff] %vm672_vm5, %v655_v46  ;;  %687 = vst.msk [vmem:[#allocation2 + $0xe0] sm:$0xff] %vm672_vm5, %v653_v45 }
 0x131   : > { %1131 = vrot.lane.b32.xlu1 %v2890_v29, %s2660_s3  ;;  %1115 = vrot.lane.b32.xlu0 %v2782_v5, %s2660_s3  ;;  %v3426_v29 = vld [vmem:[%s2762_s8 + $0xb3] sm:$0xff] }
 0x132   : > { %v3429_v5 = vld [vmem:[%s2762_s8 + $0x53] sm:$0xff] }
 0x133   : > { %v725_v4 = vpop.permute.xlu1 %724  ;;  %v723_v47 = vpop.permute.xlu0 %722 }
 0x134   : > { %772 = vst.msk [vmem:[#allocation2 + $0x10] sm:$0xff] %vm770_vm6, %v725_v4  ;;  %771 = vst.msk [vmem:[#allocation2] sm:$0xff] %vm770_vm6, %v723_v47  ;;  %v3558_v4 = vld [vmem:[%s2762_s8 + $0x7a] sm:$0xff] }
 0x135   : > { %1517 = vrot.lane.b32.xlu1 %v3414_v54, %s2665_s5  ;;  %1501 = vrot.lane.b32.xlu0 %v3417_v28, %s2665_s5  ;;  %1682 = vst.msk [vmem:[#allocation2 + $0x48] sm:$0xff] %vm186_vm0, %v3558_v4 }
 0x137   : > { %v729_v48 = vpop.permute.xlu1 %728  ;;  %v727_v49 = vpop.permute.xlu0 %726 }
 0x138   : > { %774 = vst.msk [vmem:[#allocation2 + $0x30] sm:$0xff] %vm770_vm6, %v729_v48  ;;  %773 = vst.msk [vmem:[#allocation2 + $0x20] sm:$0xff] %vm770_vm6, %v727_v49 }
 0x139   : > { %1744 = vrot.lane.b32.xlu1 %v3426_v29, %s2651_s17  ;;  %1728 = vrot.lane.b32.xlu0 %v3429_v5, %s2651_s17 }
 0x13b   : > { %v733_v50 = vpop.permute.xlu1 %732  ;;  %v731_v51 = vpop.permute.xlu0 %730 }
 0x13c   : > { %776 = vst.msk [vmem:[#allocation2 + $0x50] sm:$0xff] %vm770_vm6, %v733_v50  ;;  %775 = vst.msk [vmem:[#allocation2 + $0x40] sm:$0xff] %vm770_vm6, %v731_v51 }
 0x13d   : > { %841 = vrot.lane.b32.xlu1 %v3025_v58, %s2657_s28  ;;  %825 = vrot.lane.b32.xlu0 %v2859_v22, %s2657_s28 }
 0x13f   : > { %v737_v52 = vpop.permute.xlu1 %736  ;;  %v735_v53 = vpop.permute.xlu0 %734 }
 0x140   : > { %778 = vst.msk [vmem:[#allocation2 + $0x70] sm:$0xff] %vm770_vm6, %v737_v52  ;;  %777 = vst.msk [vmem:[#allocation2 + $0x60] sm:$0xff] %vm770_vm6, %v735_v53  ;;  %v3593_v53 = vld [vmem:[%s2762_s8 + $0xcb] sm:$0xff] }
 0x141   : > { %1228 = vrot.lane.b32.xlu1 %v3313_v55, %s2662_s18  ;;  %1212 = vrot.lane.b32.xlu0 %v3288_v57, %s2662_s18  ;;  %v3473_v55 = vld [vmem:[%s2762_s8 + $0x6a] sm:$0xff] }
 0x142   : > { %1681 = vst.msk [vmem:[#allocation2 + $0x38] sm:$0xff] %vm186_vm0, %v3473_v55 }
 0x143   : > { %v741_v58 = vpop.permute.xlu1 %740  ;;  %v739_v61 = vpop.permute.xlu0 %738 }
 0x144   : > { %780 = vst.msk [vmem:[#allocation2 + $0x90] sm:$0xff] %vm770_vm6, %v741_v58  ;;  %779 = vst.msk [vmem:[#allocation2 + $0x80] sm:$0xff] %vm770_vm6, %v739_v61  ;;  %v3596_v58 = vld [vmem:[%s2762_s8 + $0x6b] sm:$0xff] }
 0x145   : > { %1615 = vrot.lane.b32.xlu1 %v3450_v56, %s2666_s26  ;;  %1599 = vrot.lane.b32.xlu0 %v3453_v60, %s2666_s26 }
 0x147   : > { %v745_v22 = vpop.permute.xlu1 %744  ;;  %v743_v57 = vpop.permute.xlu0 %742 }
 0x148   : > { %782 = vst.msk [vmem:[#allocation2 + $0xb0] sm:$0xff] %vm770_vm6, %v745_v22  ;;  %781 = vst.msk [vmem:[#allocation2 + $0xa0] sm:$0xff] %vm770_vm6, %v743_v57 }
 0x149   : > { %938 = vrot.lane.b32.xlu1 %v3085_v32, %s2658_s29  ;;  %922 = vrot.lane.b32.xlu0 %v2935_v42, %s2658_s29 }
 0x14b   : > { %v749_v62 = vpop.permute.xlu1 %748  ;;  %v747_v63 = vpop.permute.xlu0 %746 }
 0x14c   : > { %784 = vst.msk [vmem:[#allocation2 + $0xd0] sm:$0xff] %vm770_vm6, %v749_v62  ;;  %783 = vst.msk [vmem:[#allocation2 + $0xc0] sm:$0xff] %vm770_vm6, %v747_v63 }
 0x14d   : > { %1325 = vrot.lane.b32.xlu1 %v3356_v59, %s2663_s21  ;;  %1309 = vrot.lane.b32.xlu0 %v3359_v34, %s2663_s21 }
 0x14f   : > { %v753_v42 = vpop.permute.xlu1 %752  ;;  %v751_v32 = vpop.permute.xlu0 %750 }
 0x150   : > { %786 = vst.msk [vmem:[#allocation2 + $0xf0] sm:$0xff] %vm770_vm6, %v753_v42  ;;  %785 = vst.msk [vmem:[#allocation2 + $0xe0] sm:$0xff] %vm770_vm6, %v751_v32 }
 0x151   : > { %1036 = vrot.lane.b32.xlu1 %v3374_v44, %s2659_s30  ;;  %1020 = vrot.lane.b32.xlu0 %v3377_v14, %s2659_s30  ;;  %v3535_v14 = vld [vmem:[%s2762_s8 + $0xc1] sm:$0xff] }
 0x153   : > { %v822_v1 = vpop.permute.xlu1 %821  ;;  %v820_v3 = vpop.permute.xlu0 %819 }
 0x154   : > { %869 = vst.msk [vmem:[#allocation2 + $0x10] sm:$0xff] %vm867_vm7, %v822_v1  ;;  %868 = vst.msk [vmem:[#allocation2] sm:$0xff] %vm867_vm7, %v820_v3  ;;  %v3615_v1 = vld [vmem:[%s2762_s8 + $0xe2] sm:$0xff] }
 0x155   : > { %1422 = vrot.lane.b32.xlu1 %v3129_v20, %s2664_s25  ;;  %1406 = vrot.lane.b32.xlu0 %v3132_v21, %s2664_s25  ;;  %v3618_v3 = vld [vmem:[%s2762_s8 + $0x82] sm:$0xff]  ;;  %1691 = vst.msk [vmem:[#allocation2 + $0xd8] sm:$0xff] %vm186_vm0, %v3615_v1 }
 0x156   : > { %1683 = vst.msk [vmem:[#allocation2 + $0x58] sm:$0xff] %vm186_vm0, %v3618_v3 }
 0x157   : > { %v836_v7 = vpop.permute.xlu1 %835  ;;  %v824_v11 = vpop.permute.xlu0 %823 }
 0x158   : > { %876 = vst.msk [vmem:[#allocation2 + $0x80] sm:$0xff] %vm867_vm7, %v836_v7  ;;  %870 = vst.msk [vmem:[#allocation2 + $0x20] sm:$0xff] %vm867_vm7, %v824_v11 }
 0x159   : > { %1133 = vrot.lane.b32.xlu1 %v3496_v6, %s2660_s3  ;;  %1117 = vrot.lane.b32.xlu0 %v2273_v41, %s2660_s3 }
 0x15b   : > { %v933_v12 = vpop.permute.xlu1 %932  ;;  %v917_v13 = vpop.permute.xlu0 %916 }
 0x15c   : > { %973 = vst.msk [vmem:[#allocation2 + $0x80] sm:$0xff] %vm964_vm8, %v933_v12  ;;  %965 = vst.msk [vmem:[#allocation2] sm:$0xff] %vm964_vm8, %v917_v13 }
 0x15d   : > { %1519 = vrot.lane.b32.xlu1 %v3330_v8, %s2665_s5  ;;  %1503 = vrot.lane.b32.xlu0 %v3308_v10, %s2665_s5 }
 0x15f   : > { %v1031_v30 = vpop.permute.xlu1 %1030  ;;  %v1015_v31 = vpop.permute.xlu0 %1014 }
 0x160   : > { %1071 = vst.msk [vmem:[#allocation2 + $0x80] sm:$0xff] %vm1062_vm9, %v1031_v30  ;;  %1063 = vst.msk [vmem:[#allocation2] sm:$0xff] %vm1062_vm9, %v1015_v31 }
 0x161   : > { %1746 = vrot.lane.b32.xlu1 %v3511_v24, %s2651_s17  ;;  %1730 = vrot.lane.b32.xlu0 %v3514_v25, %s2651_s17 }
 0x163   : > { %v1128_v36 = vpop.permute.xlu1 %1127  ;;  %v1112_v37 = vpop.permute.xlu0 %1111 }
 0x164   : > { %1168 = vst.msk [vmem:[#allocation2 + $0x80] sm:$0xff] %vm1159_vm10, %v1128_v36  ;;  %1160 = vst.msk [vmem:[#allocation2] sm:$0xff] %vm1159_vm10, %v1112_v37 }
 0x165   : > { %843 = vrot.lane.b32.xlu1 %v2234_v23, %s2657_s28  ;;  %827 = vrot.lane.b32.xlu0 %v2226_v35, %s2657_s28 }
 0x167   : > { %v1209_v40 = vpop.permute.xlu1 %1208  ;;  %v838_v44 = vpop.permute.xlu0 %837 }
 0x168   : > { %1257 = vst.msk [vmem:[#allocation2] sm:$0xff] %vm1256_vm11, %v1209_v40 }
 0x169   : > { %877 = vst.msk [vmem:[#allocation2 + $0x90] sm:$0xff] %vm867_vm7, %v838_v44  ;;  %1230 = vrot.lane.b32.xlu1 %v3414_v54, %s2662_s18  ;;  %1214 = vrot.lane.b32.xlu0 %v3417_v28, %s2662_s18  ;;  %v3555_v28 = vld [vmem:[%s2762_s8 + $0xda] sm:$0xff] }
 0x16a   : > { %1690 = vst.msk [vmem:[#allocation2 + $0xc8] sm:$0xff] %vm186_vm0, %v3555_v28 }
 0x16b   : > { %v919_v15 = vpop.permute.xlu1 %918  ;;  %v1225_v43 = vpop.permute.xlu0 %1224 }
 0x16c   : > { %966 = vst.msk [vmem:[#allocation2 + $0x10] sm:$0xff] %vm964_vm8, %v919_v15 }
 0x16d   : > { %1265 = vst.msk [vmem:[#allocation2 + $0x80] sm:$0xff] %vm1256_vm11, %v1225_v43  ;;  %1617 = vrot.lane.b32.xlu1 %v3535_v14, %s2666_s26  ;;  %1601 = vrot.lane.b32.xlu0 %v3538_v26, %s2666_s26  ;;  %v3677_v43 = vld [vmem:[%s2762_s8 + $0xdb] sm:$0xff] }
 0x16f   : > { %v1306_v19 = vpop.permute.xlu1 %1305  ;;  %v935_v46 = vpop.permute.xlu0 %934 }
 0x170   : > { %1354 = vst.msk [vmem:[#allocation2] sm:$0xff] %vm1353_vm12, %v1306_v19 }
 0x171   : > { %974 = vst.msk [vmem:[#allocation2 + $0x90] sm:$0xff] %vm964_vm8, %v935_v46  ;;  %940 = vrot.lane.b32.xlu1 %v2250_v33, %s2658_s29  ;;  %924 = vrot.lane.b32.xlu0 %v2242_v18, %s2658_s29 }
 0x173   : > { %v1017_v45 = vpop.permute.xlu1 %1016  ;;  %v1322_v54 = vpop.permute.xlu0 %1321 }
 0x174   : > { %1064 = vst.msk [vmem:[#allocation2 + $0x10] sm:$0xff] %vm1062_vm9, %v1017_v45 }
 0x175   : > { %1362 = vst.msk [vmem:[#allocation2 + $0x80] sm:$0xff] %vm1353_vm12, %v1322_v54  ;;  %1327 = vrot.lane.b32.xlu1 %v3450_v56, %s2663_s21  ;;  %1311 = vrot.lane.b32.xlu0 %v3453_v60, %s2663_s21 }
 0x177   : > { %v1403_v47 = vpop.permute.xlu1 %1402  ;;  %v1033_v48 = vpop.permute.xlu0 %1032 }
 0x178   : > { %1451 = vst.msk [vmem:[#allocation2] sm:$0xff] %vm1450_vm13, %v1403_v47 }
 0x179   : > { %1072 = vst.msk [vmem:[#allocation2 + $0x90] sm:$0xff] %vm1062_vm9, %v1033_v48  ;;  %1038 = vrot.lane.b32.xlu1 %v3356_v59, %s2659_s30  ;;  %1022 = vrot.lane.b32.xlu0 %v3359_v34, %s2659_s30  ;;  %v3700_v48 = vld [vmem:[%s2762_s8 + $0xd9] sm:$0xff] }
 0x17b   : > { %v1114_v49 = vpop.permute.xlu1 %1113  ;;  %v1419_v50 = vpop.permute.xlu0 %1418 }
 0x17c   : > { %1161 = vst.msk [vmem:[#allocation2 + $0x10] sm:$0xff] %vm1159_vm10, %v1114_v49  ;;  %v3703_v49 = vld [vmem:[%s2762_s8 + $0x79] sm:$0xff] }
 0x17d   : > { %1459 = vst.msk [vmem:[#allocation2 + $0x80] sm:$0xff] %vm1450_vm13, %v1419_v50  ;;  %1424 = vrot.lane.b32.xlu1 %v3229_v38, %s2664_s25  ;;  %1408 = vrot.lane.b32.xlu0 %v3232_v39, %s2664_s25 }
 0x17f   : > { %v1500_v51 = vpop.permute.xlu1 %1499  ;;  %v1130_v59 = vpop.permute.xlu0 %1129 }
 0x180   : > { %1548 = vst.msk [vmem:[#allocation2] sm:$0xff] %vm1547_vm14, %v1500_v51 }
 0x181   : > { %1169 = vst.msk [vmem:[#allocation2 + $0x90] sm:$0xff] %vm1159_vm10, %v1130_v59  ;;  %1135 = vrot.lane.b32.xlu1 %v3129_v20, %s2660_s3  ;;  %1119 = vrot.lane.b32.xlu0 %v3132_v21, %s2660_s3 }
 0x183   : > { %v1727_v34 = vpop.permute.xlu1 %1726  ;;  %v1516_v52 = vpop.permute.xlu0 %1515 }
 0x184   : > { %1774 = vst.msk [vmem:[#allocation2 + $0x8] sm:$0xff] %vm283_vm1, %v1727_v34 }
 0x185   : > { %1556 = vst.msk [vmem:[#allocation2 + $0x80] sm:$0xff] %vm1547_vm14, %v1516_v52  ;;  %1521 = vrot.lane.b32.xlu1 %v3426_v29, %s2665_s5  ;;  %1505 = vrot.lane.b32.xlu0 %v3429_v5, %s2665_s5 }
 0x187   : > { %v840_v61 = vpop.permute.xlu1 %839  ;;  %v1743_v22 = vpop.permute.xlu0 %1742 }
 0x188   : > { %878 = vst.msk [vmem:[#allocation2 + $0xa0] sm:$0xff] %vm867_vm7, %v840_v61 }
 0x189   : > { %1782 = vst.msk [vmem:[#allocation2 + $0x88] sm:$0xff] %vm283_vm1, %v1743_v22  ;;  %1748 = vrot.lane.b32.xlu1 %v3593_v53, %s2651_s17  ;;  %1732 = vrot.lane.b32.xlu0 %v3596_v58, %s2651_s17 }
 0x18b   : > { %v1227_v21 = vpop.permute.xlu1 %1226  ;;  %v1211_v57 = vpop.permute.xlu0 %1210  ;;  %v1791_v62 = vld [vmem:[#allocation2 + $0x8] sm:$0xff] }
 0x18c   : > { %1266 = vst.msk [vmem:[#allocation2 + $0x90] sm:$0xff] %vm1256_vm11, %v1227_v21  ;;  %1258 = vst.msk [vmem:[#allocation2 + $0x10] sm:$0xff] %vm1256_vm11, %v1211_v57  ;;  %2398 = vmatprep.mubr.msk.f32.mxu0 %vm1840_vm15, %v1791_v62 }
 0x18d   : > { %845 = vrot.lane.b32.xlu1 %v3301_v9, %s2657_s28  ;;  %829 = vrot.lane.b32.xlu0 %v3496_v6, %s2657_s28  ;;  %v3629_v9 = vld [vmem:[%s2762_s8 + $0xc9] sm:$0xff] }
 0x18e   : > { %v3632_v6 = vld [vmem:[%s2762_s8 + $0x69] sm:$0xff] }
 0x18f   : > { %v1614_v63 = vpop.permute.xlu1 %1613  ;;  %v1598_v42 = vpop.permute.xlu0 %1597 }
 0x190   : > { %v1807_v32 = vld [vmem:[#allocation2 + $0x88] sm:$0xff]  ;;  %1654 = vst.msk [vmem:[#allocation2 + $0x80] sm:$0xff] %vm1645_vm2, %v1614_v63  ;;  %1646 = vst.msk [vmem:[#allocation2] sm:$0xff] %vm1645_vm2, %v1598_v42 }
 0x191   : > { %2406 = vmatprep.mubr.msk.f32.mxu1 %vm1840_vm15, %v1807_v32  ;;  %1232 = vrot.lane.b32.xlu1 %v3330_v8, %s2662_s18  ;;  %v2243_v8 = vld [vmem:[%s2762_s8 + $0x9c] sm:$0xff] }
 0x192   : > { %1216 = vrot.lane.b32.xlu0 %v3308_v10, %s2662_s18  ;;  %v2251_v10 = vld [vmem:[%s2762_s8 + $0xfc] sm:$0xff] }
 0x193   : > { %v937_v41 = vpop.permute.xlu1 %936  ;;  %v921_v7 = vpop.permute.xlu0 %920 }
 0x194   : > { %975 = vst.msk [vmem:[#allocation2 + $0xa0] sm:$0xff] %vm964_vm8, %v937_v41  ;;  %967 = vst.msk [vmem:[#allocation2 + $0x20] sm:$0xff] %vm964_vm8, %v921_v7  ;;  %v3748_v41 = vld [vmem:[%s2762_s8 + $0xe3] sm:$0xff] }
 0x195   : > { %1619 = vrot.lane.b32.xlu1 %v3629_v9, %s2666_s26 }
 0x196   : > { %1603 = vrot.lane.b32.xlu0 %v3632_v6, %s2666_s26 }
 0x197   : > { %v1324_v11 = vpop.permute.xlu1 %1323  ;;  %v1308_v12 = vpop.permute.xlu0 %1307  ;;  %v1790_v13 = vld [vmem:[#allocation2] sm:$0xff] }
 0x198   : > { %v1806_v30 = vld [vmem:[#allocation2 + $0x80] sm:$0xff]  ;;  %1363 = vst.msk [vmem:[#allocation2 + $0x90] sm:$0xff] %vm1353_vm12, %v1324_v11  ;;  %1355 = vst.msk [vmem:[#allocation2 + $0x10] sm:$0xff] %vm1353_vm12, %v1308_v12  ;;  %1954 = vmatmul.mubr.f32.vlgmr.msra.gmra.mrb[0].mxu0 %v1790_v13 }
 0x199   : > { %1994 = vmatmul.mubr.f32.vlgmr.msra.gmra.mrb[0].mxu1 %v1806_v30  ;;  %942 = vrot.lane.b32.xlu1 %v2251_v10, %s2658_s29  ;;  %v3771_v30 = vld [vmem:[%s2762_s8 + $0xe1] sm:$0xff] }
 0x19a   : > { %926 = vrot.lane.b32.xlu0 %v2243_v8, %s2658_s29 }
 0x19b   : > { %v1035_v31 = vpop.permute.xlu1 %1034  ;;  %v1019_v23 = vpop.permute.xlu0 %1018 }
 0x19c   : > { %1073 = vst.msk [vmem:[#allocation2 + $0xa0] sm:$0xff] %vm1062_vm9, %v1035_v31  ;;  %1065 = vst.msk [vmem:[#allocation2 + $0x20] sm:$0xff] %vm1062_vm9, %v1019_v23  ;;  %v3774_v31 = vld [vmem:[%s2762_s8 + $0x81] sm:$0xff] }
 0x19d   : > { %1329 = vrot.lane.b32.xlu1 %v3535_v14, %s2663_s21 }
 0x19e   : > { %1313 = vrot.lane.b32.xlu0 %v3538_v26, %s2663_s21 }
 0x19f   : > { %v1421_v35 = vpop.permute.xlu1 %1420  ;;  %v1405_v36 = vpop.permute.xlu0 %1404 }
 0x1a0   : > { %1460 = vst.msk [vmem:[#allocation2 + $0x90] sm:$0xff] %vm1450_vm13, %v1421_v35  ;;  %1452 = vst.msk [vmem:[#allocation2 + $0x10] sm:$0xff] %vm1450_vm13, %v1405_v36 }
 0x1a1   : > { %1040 = vrot.lane.b32.xlu1 %v3450_v56, %s2659_s30 }
 0x1a2   : > { %1024 = vrot.lane.b32.xlu0 %v3453_v60, %s2659_s30 }
 0x1a3   : > { %v1132_v37 = vpop.permute.xlu1 %1131  ;;  %v1116_v40 = vpop.permute.xlu0 %1115 }
 0x1a4   : > { %1170 = vst.msk [vmem:[#allocation2 + $0xa0] sm:$0xff] %vm1159_vm10, %v1132_v37  ;;  %1162 = vst.msk [vmem:[#allocation2 + $0x20] sm:$0xff] %vm1159_vm10, %v1116_v40 }
 0x1a5   : > { %1426 = vrot.lane.b32.xlu1 %v3382_v16, %s2664_s25 }
 0x1a6   : > { %1410 = vrot.lane.b32.xlu0 %v3385_v17, %s2664_s25 }
 0x1a7   : > { %v1518_v44 = vpop.permute.xlu1 %1517  ;;  %v1502_v15 = vpop.permute.xlu0 %1501 }
 0x1a8   : > { %1557 = vst.msk [vmem:[#allocation2 + $0x90] sm:$0xff] %vm1547_vm14, %v1518_v44  ;;  %1549 = vst.msk [vmem:[#allocation2 + $0x10] sm:$0xff] %vm1547_vm14, %v1502_v15 }
 0x1a9   : > { %1137 = vrot.lane.b32.xlu1 %v3229_v38, %s2660_s3 }
 0x1aa   : > { %1121 = vrot.lane.b32.xlu0 %v3232_v39, %s2660_s3  ;;  %v2236_v39 = vld [vmem:[%s2762_s8 + $0x10a] sm:$0xff] }
 0x1ab   : > { %v1745_v56 = vpop.permute.xlu1 %1744  ;;  %v1729_v60 = vpop.permute.xlu0 %1728 }
 0x1ac   : > { %1783 = vst.msk [vmem:[#allocation2 + $0x98] sm:$0xff] %vm283_vm1, %v1745_v56  ;;  %1775 = vst.msk [vmem:[#allocation2 + $0x18] sm:$0xff] %vm283_vm1, %v1729_v60 }
 0x1ad   : > { %1523 = vrot.lane.b32.xlu1 %v3511_v24, %s2665_s5 }
 0x1ae   : > { %1507 = vrot.lane.b32.xlu0 %v3514_v25, %s2665_s5 }
 0x1af   : > { %v842_v33 = vpop.permute.xlu1 %841  ;;  %v826_v18 = vpop.permute.xlu0 %825 }
 0x1b0   : > { %879 = vst.msk [vmem:[#allocation2 + $0xb0] sm:$0xff] %vm867_vm7, %v842_v33  ;;  %871 = vst.msk [vmem:[#allocation2 + $0x30] sm:$0xff] %vm867_vm7, %v826_v18  ;;  %v2380_v33 = vld [vmem:[%s2762_s8 + $0xf2] sm:$0xff] }
 0x1b1   : > { %1750 = vrot.lane.b32.xlu1 %v3677_v43, %s2651_s17  ;;  %1692 = vst.msk [vmem:[#allocation2 + $0xe8] sm:$0xff] %vm186_vm0, %v2380_v33 }
 0x1b2   : > { %1734 = vrot.lane.b32.xlu0 %v3199_v0, %s2651_s17 }
 0x1b3   : > { %v1229_v19 = vpop.permute.xlu1 %1228  ;;  %v1213_v46 = vpop.permute.xlu0 %1212  ;;  %v1793_v45 = vld [vmem:[#allocation2 + $0x18] sm:$0xff] }
 0x1b4   : > { %v1809_v54 = vld [vmem:[#allocation2 + $0x98] sm:$0xff]  ;;  %1267 = vst.msk [vmem:[#allocation2 + $0xa0] sm:$0xff] %vm1256_vm11, %v1229_v19  ;;  %1259 = vst.msk [vmem:[#allocation2 + $0x20] sm:$0xff] %vm1256_vm11, %v1213_v46  ;;  %2399 = vmatprep.mubr.msk.f32.mxu0 %vm1840_vm15, %v1793_v45 }
 0x1b5   : > { %2407 = vmatprep.mubr.msk.f32.mxu1 %vm1840_vm15, %v1809_v54  ;;  %847 = vrot.lane.b32.xlu1 %v2236_v39, %s2657_s28  ;;  %v2372_v19 = vld [vmem:[%s2762_s8 + $0x92] sm:$0xff]  ;;  %v2340_v46 = vld [vmem:[%s2762_s8 + $0x7b] sm:$0xff] }
 0x1b6   : > { %831 = vrot.lane.b32.xlu0 %v3129_v20, %s2657_s28  ;;  %v2252_v20 = vld [vmem:[%s2762_s8 + $0x10c] sm:$0xff]  ;;  %1684 = vst.msk [vmem:[#allocation2 + $0x68] sm:$0xff] %vm186_vm0, %v2372_v19 }
 0x1b7   : > { %v1616_v0 = vpop.permute.xlu1 %1615  ;;  %v1600_v47 = vpop.permute.xlu0 %1599 }
 0x1b8   : > { %1655 = vst.msk [vmem:[#allocation2 + $0x90] sm:$0xff] %vm1645_vm2, %v1616_v0  ;;  %1647 = vst.msk [vmem:[#allocation2 + $0x10] sm:$0xff] %vm1645_vm2, %v1600_v47 }
 0x1b9   : > { %1234 = vrot.lane.b32.xlu1 %v3426_v29, %s2662_s18  ;;  %v2244_v29 = vld [vmem:[%s2762_s8 + $0xac] sm:$0xff] }
 0x1ba   : > { %1218 = vrot.lane.b32.xlu0 %v3429_v5, %s2662_s18 }
 0x1bb   : > { %v939_v50 = vpop.permute.xlu1 %938  ;;  %v923_v51 = vpop.permute.xlu0 %922 }
 0x1bc   : > { %976 = vst.msk [vmem:[#allocation2 + $0xb0] sm:$0xff] %vm964_vm8, %v939_v50  ;;  %968 = vst.msk [vmem:[#allocation2 + $0x30] sm:$0xff] %vm964_vm8, %v923_v51  ;;  %v2356_v50 = vld [vmem:[%s2762_s8 + $0x91] sm:$0xff] }
 0x1bd   : > { %1621 = vrot.lane.b32.xlu1 %v3700_v48, %s2666_s26 }
 0x1be   : > { %1605 = vrot.lane.b32.xlu0 %v3703_v49, %s2666_s26 }
 0x1bf   : > { %v1326_v59 = vpop.permute.xlu1 %1325  ;;  %v1310_v5 = vpop.permute.xlu0 %1309  ;;  %v1792_v34 = vld [vmem:[#allocation2 + $0x10] sm:$0xff] }
 0x1c0   : > { %v1808_v52 = vld [vmem:[#allocation2 + $0x90] sm:$0xff]  ;;  %1364 = vst.msk [vmem:[#allocation2 + $0xa0] sm:$0xff] %vm1353_vm12, %v1326_v59  ;;  %1356 = vst.msk [vmem:[#allocation2 + $0x20] sm:$0xff] %vm1353_vm12, %v1310_v5  ;;  %1959 = vmatmul.mubr.f32.gmra.mrb[2].mxu0 %v1792_v34  ;;  %v2373_v5 = vld [vmem:[%s2762_s8 + $0x9a] sm:$0xff] }
 0x1c1   : > { %1999 = vmatmul.mubr.f32.gmra.mrb[2].mxu1 %v1808_v52  ;;  %944 = vrot.lane.b32.xlu1 %v2252_v20, %s2658_s29  ;;  %1685 = vst.msk [vmem:[#allocation2 + $0x78] sm:$0xff] %vm186_vm0, %v2373_v5 }
 0x1c2   : > { %928 = vrot.lane.b32.xlu0 %v2244_v29, %s2658_s29 }
 0x1c3   : > { %v1037_v61 = vpop.permute.xlu1 %1036  ;;  %v1021_v22 = vpop.permute.xlu0 %1020 }
 0x1c4   : > { %1074 = vst.msk [vmem:[#allocation2 + $0xb0] sm:$0xff] %vm1062_vm9, %v1037_v61  ;;  %1066 = vst.msk [vmem:[#allocation2 + $0x30] sm:$0xff] %vm1062_vm9, %v1021_v22  ;;  %v2341_v61 = vld [vmem:[%s2762_s8 + $0x83] sm:$0xff] }
 0x1c5   : > { %1331 = vrot.lane.b32.xlu1 %v3629_v9, %s2663_s21 }
 0x1c6   : > { %1315 = vrot.lane.b32.xlu0 %v3632_v6, %s2663_s21 }
 0x1c7   : > { %v1423_v21 = vpop.permute.xlu1 %1422  ;;  %v1407_v57 = vpop.permute.xlu0 %1406 }
 0x1c8   : > { %1461 = vst.msk [vmem:[#allocation2 + $0xa0] sm:$0xff] %vm1450_vm13, %v1423_v21  ;;  %1453 = vst.msk [vmem:[#allocation2 + $0x20] sm:$0xff] %vm1450_vm13, %v1407_v57  ;;  %v2397_v57 = vld [vmem:[%s2762_s8 + $0xfb] sm:$0xff] }
 0x1c9   : > { %1042 = vrot.lane.b32.xlu1 %v3535_v14, %s2659_s30 }
 0x1ca   : > { %1026 = vrot.lane.b32.xlu0 %v3538_v26, %s2659_s30 }
 0x1cb   : > { %v1134_v62 = vpop.permute.xlu1 %1133  ;;  %v1118_v63 = vpop.permute.xlu0 %1117 }
 0x1cc   : > { %1171 = vst.msk [vmem:[#allocation2 + $0xb0] sm:$0xff] %vm1159_vm10, %v1134_v62  ;;  %1163 = vst.msk [vmem:[#allocation2 + $0x30] sm:$0xff] %vm1159_vm10, %v1118_v63  ;;  %v2389_v62 = vld [vmem:[%s2762_s8 + $0x9b] sm:$0xff] }
 0x1cd   : > { %1428 = vrot.lane.b32.xlu1 %v3470_v2, %s2664_s25 }
 0x1ce   : > { %1412 = vrot.lane.b32.xlu0 %v3473_v55, %s2664_s25 }
 0x1cf   : > { %v1520_v42 = vpop.permute.xlu1 %1519  ;;  %v1504_v32 = vpop.permute.xlu0 %1503 }
 0x1d0   : > { %1558 = vst.msk [vmem:[#allocation2 + $0xa0] sm:$0xff] %vm1547_vm14, %v1520_v42  ;;  %1550 = vst.msk [vmem:[#allocation2 + $0x20] sm:$0xff] %vm1547_vm14, %v1504_v32  ;;  %v2357_v42 = vld [vmem:[%s2762_s8 + $0x99] sm:$0xff] }
 0x1d1   : > { %1139 = vrot.lane.b32.xlu1 %v3382_v16, %s2660_s3  ;;  %v2237_v16 = vld [vmem:[%s2762_s8 + $0x112] sm:$0xff] }
 0x1d2   : > { %1123 = vrot.lane.b32.xlu0 %v3385_v17, %s2660_s3 }
 0x1d3   : > { %v1747_v14 = vpop.permute.xlu1 %1746  ;;  %v1731_v26 = vpop.permute.xlu0 %1730 }
 0x1d4   : > { %1784 = vst.msk [vmem:[#allocation2 + $0xa8] sm:$0xff] %vm283_vm1, %v1747_v14  ;;  %1776 = vst.msk [vmem:[#allocation2 + $0x28] sm:$0xff] %vm283_vm1, %v1731_v26 }
 0x1d5   : > { %1525 = vrot.lane.b32.xlu1 %v3593_v53, %s2665_s5 }
 0x1d6   : > { %1509 = vrot.lane.b32.xlu0 %v3596_v58, %s2665_s5 }
 0x1d7   : > { %v844_v7 = vpop.permute.xlu1 %843  ;;  %v828_v10 = vpop.permute.xlu0 %827 }
 0x1d8   : > { %880 = vst.msk [vmem:[#allocation2 + $0xc0] sm:$0xff] %vm867_vm7, %v844_v7  ;;  %872 = vst.msk [vmem:[#allocation2 + $0x40] sm:$0xff] %vm867_vm7, %v828_v10 }
 0x1d9   : > { %1752 = vrot.lane.b32.xlu1 %v3748_v41, %s2651_s17 }
 0x1da   : > { %1736 = vrot.lane.b32.xlu0 %v3347_v27, %s2651_s17 }
 0x1db   : > { %v1231_v17 = vpop.permute.xlu1 %1230  ;;  %v1215_v8 = vpop.permute.xlu0 %1214  ;;  %v1795_v11 = vld [vmem:[#allocation2 + $0x28] sm:$0xff] }
 0x1dc   : > { %v1811_v12 = vld [vmem:[#allocation2 + $0xa8] sm:$0xff]  ;;  %1268 = vst.msk [vmem:[#allocation2 + $0xb0] sm:$0xff] %vm1256_vm11, %v1231_v17  ;;  %1260 = vst.msk [vmem:[#allocation2 + $0x30] sm:$0xff] %vm1256_vm11, %v1215_v8  ;;  %2400 = vmatprep.mubr.msk.f32.mxu0 %vm1840_vm15, %v1795_v11 }
 0x1dd   : > { %2408 = vmatprep.mubr.msk.f32.mxu1 %vm1840_vm15, %v1811_v12  ;;  %849 = vrot.lane.b32.xlu1 %v2237_v16, %s2657_s28 }
 0x1de   : > { %833 = vrot.lane.b32.xlu0 %v3229_v38, %s2657_s28  ;;  %v2253_v38 = vld [vmem:[%s2762_s8 + $0x114] sm:$0xff] }
 0x1df   : > { %v1618_v27 = vpop.permute.xlu1 %1617  ;;  %v1602_v13 = vpop.permute.xlu0 %1601 }
 0x1e0   : > { %1656 = vst.msk [vmem:[#allocation2 + $0xa0] sm:$0xff] %vm1645_vm2, %v1618_v27  ;;  %1648 = vst.msk [vmem:[#allocation2 + $0x20] sm:$0xff] %vm1645_vm2, %v1602_v13 }
 0x1e1   : > { %1236 = vrot.lane.b32.xlu1 %v3511_v24, %s2662_s18  ;;  %v2245_v24 = vld [vmem:[%s2762_s8 + $0xb4] sm:$0xff] }
 0x1e2   : > { %1220 = vrot.lane.b32.xlu0 %v3514_v25, %s2662_s18 }
 0x1e3   : > { %v941_v23 = vpop.permute.xlu1 %940  ;;  %v925_v35 = vpop.permute.xlu0 %924 }
 0x1e4   : > { %977 = vst.msk [vmem:[#allocation2 + $0xc0] sm:$0xff] %vm964_vm8, %v941_v23  ;;  %969 = vst.msk [vmem:[#allocation2 + $0x40] sm:$0xff] %vm964_vm8, %v925_v35 }
 0x1e5   : > { %1623 = vrot.lane.b32.xlu1 %v3771_v30, %s2666_s26 }
 0x1e6   : > { %1607 = vrot.lane.b32.xlu0 %v3774_v31, %s2666_s26 }
 0x1e7   : > { %v1328_v36 = vpop.permute.xlu1 %1327  ;;  %v1312_v25 = vpop.permute.xlu0 %1311  ;;  %v1794_v37 = vld [vmem:[#allocation2 + $0x20] sm:$0xff] }
 0x1e8   : > { %v1810_v40 = vld [vmem:[#allocation2 + $0xa0] sm:$0xff]  ;;  %1365 = vst.msk [vmem:[#allocation2 + $0xb0] sm:$0xff] %vm1353_vm12, %v1328_v36  ;;  %1357 = vst.msk [vmem:[#allocation2 + $0x30] sm:$0xff] %vm1353_vm12, %v1312_v25  ;;  %1964 = vmatmul.mubr.f32.gmra.mrb[4].mxu0 %v1794_v37 }
 0x1e9   : > { %2004 = vmatmul.mubr.f32.gmra.mrb[4].mxu1 %v1810_v40  ;;  %946 = vrot.lane.b32.xlu1 %v2253_v38, %s2658_s29 }
 0x1ea   : > { %930 = vrot.lane.b32.xlu0 %v2245_v24, %s2658_s29 }
 0x1eb   : > { %v1039_v44 = vpop.permute.xlu1 %1038  ;;  %v1023_v15 = vpop.permute.xlu0 %1022 }
 0x1ec   : > { %1075 = vst.msk [vmem:[#allocation2 + $0xc0] sm:$0xff] %vm1062_vm9, %v1039_v44  ;;  %1067 = vst.msk [vmem:[#allocation2 + $0x40] sm:$0xff] %vm1062_vm9, %v1023_v15 }
 0x1ed   : > { %1333 = vrot.lane.b32.xlu1 %v3700_v48, %s2663_s21 }
 0x1ee   : > { %1317 = vrot.lane.b32.xlu0 %v3703_v49, %s2663_s21  ;;  %v2364_v49 = vld [vmem:[%s2762_s8 + $0xf1] sm:$0xff] }
 0x1ef   : > { %v1425_v56 = vpop.permute.xlu1 %1424  ;;  %v1409_v60 = vpop.permute.xlu0 %1408 }
 0x1f0   : > { %1462 = vst.msk [vmem:[#allocation2 + $0xb0] sm:$0xff] %vm1450_vm13, %v1425_v56  ;;  %1454 = vst.msk [vmem:[#allocation2 + $0x30] sm:$0xff] %vm1450_vm13, %v1409_v60 }
 0x1f1   : > { %1044 = vrot.lane.b32.xlu1 %v3629_v9, %s2659_s30 }
 0x1f2   : > { %1028 = vrot.lane.b32.xlu0 %v3632_v6, %s2659_s30  ;;  %s2415_s30 = sshll.u32 %s2633_s12, 4 }
 0x1f3   : > { %v1136_v18 = vpop.permute.xlu1 %1135  ;;  %v1120_v39 = vpop.permute.xlu0 %1119 }
 0x1f4   : > { %1172 = vst.msk [vmem:[#allocation2 + $0xc0] sm:$0xff] %vm1159_vm10, %v1136_v18  ;;  %1164 = vst.msk [vmem:[#allocation2 + $0x40] sm:$0xff] %vm1159_vm10, %v1120_v39 }
 0x1f5   : > { %1430 = vrot.lane.b32.xlu1 %v3555_v28, %s2664_s25  ;;  %v2396_v28 = vld [vmem:[%s2762_s8 + $0xf3] sm:$0xff] }
 0x1f6   : > { %1414 = vrot.lane.b32.xlu0 %v3558_v4, %s2664_s25  ;;  %v2388_v4 = vld [vmem:[%s2762_s8 + $0x93] sm:$0xff] }
 0x1f7   : > { %v1522_v9 = vpop.permute.xlu1 %1521  ;;  %v1506_v6 = vpop.permute.xlu0 %1505 }
 0x1f8   : > { %1559 = vst.msk [vmem:[#allocation2 + $0xb0] sm:$0xff] %vm1547_vm14, %v1522_v9  ;;  %1551 = vst.msk [vmem:[#allocation2 + $0x30] sm:$0xff] %vm1547_vm14, %v1506_v6 }
 0x1f9   : > { %1141 = vrot.lane.b32.xlu1 %v3470_v2, %s2660_s3 }
 0x1fa   : > { %1125 = vrot.lane.b32.xlu0 %v3473_v55, %s2660_s3  ;;  %s2416_s3 = sshll.u32 %s2637_s13, 5 }
 0x1fb   : > { %v1749_v45 = vpop.permute.xlu1 %1748  ;;  %v1733_v54 = vpop.permute.xlu0 %1732 }
 0x1fc   : > { %1785 = vst.msk [vmem:[#allocation2 + $0xb8] sm:$0xff] %vm283_vm1, %v1749_v45  ;;  %1777 = vst.msk [vmem:[#allocation2 + $0x38] sm:$0xff] %vm283_vm1, %v1733_v54 }
 0x1fd   : > { %1527 = vrot.lane.b32.xlu1 %v3677_v43, %s2665_s5 }
 0x1fe   : > { %1511 = vrot.lane.b32.xlu0 %v2340_v46, %s2665_s5 }
 0x1ff   : > { %v846_v0 = vpop.permute.xlu1 %845  ;;  %v830_v2 = vpop.permute.xlu0 %829 }
 0x200   : > { %881 = vst.msk [vmem:[#allocation2 + $0xd0] sm:$0xff] %vm867_vm7, %v846_v0  ;;  %873 = vst.msk [vmem:[#allocation2 + $0x50] sm:$0xff] %vm867_vm7, %v830_v2 }
 0x201   : > { %1754 = vrot.lane.b32.xlu1 %v2396_v28, %s2651_s17 }
 0x202   : > { %1738 = vrot.lane.b32.xlu0 %v2388_v4, %s2651_s17 }
 0x203   : > { %v1233_v55 = vpop.permute.xlu1 %1232  ;;  %v1797_v48 = vld [vmem:[#allocation2 + $0x38] sm:$0xff] }
 0x204   : > { %v1217_v47 = vpop.permute.xlu0 %1216  ;;  %v1813_v43 = vld [vmem:[#allocation2 + $0xb8] sm:$0xff]  ;;  %1269 = vst.msk [vmem:[#allocation2 + $0xc0] sm:$0xff] %vm1256_vm11, %v1233_v55  ;;  %2401 = vmatprep.mubr.msk.f32.mxu0 %vm1840_vm15, %v1797_v48 }
 0x205   : > { %1261 = vst.msk [vmem:[#allocation2 + $0x40] sm:$0xff] %vm1256_vm11, %v1217_v47  ;;  %2409 = vmatprep.mubr.msk.f32.mxu1 %vm1840_vm15, %v1813_v43  ;;  %1238 = vrot.lane.b32.xlu1 %v3593_v53, %s2662_s18 }
 0x206   : > { %1222 = vrot.lane.b32.xlu0 %v3596_v58, %s2662_s18  ;;  %s2063_s18 = sadd.s32 %s2416_s3, %s2415_s30 }
 0x207   : > { %v1620_v51 = vpop.permute.xlu1 %1619 }
 0x208   : > { %v1604_v20 = vpop.permute.xlu0 %1603  ;;  %1657 = vst.msk [vmem:[#allocation2 + $0xb0] sm:$0xff] %vm1645_vm2, %v1620_v51 }
 0x209   : > { %1649 = vst.msk [vmem:[#allocation2 + $0x30] sm:$0xff] %vm1645_vm2, %v1604_v20  ;;  %1625 = vrot.lane.b32.xlu1 %v2364_v49, %s2666_s26 }
 0x20a   : > { %1609 = vrot.lane.b32.xlu0 %v2356_v50, %s2666_s26 }
 0x20b   : > { %v943_v29 = vpop.permute.xlu1 %942 }
 0x20c   : > { %v927_v59 = vpop.permute.xlu0 %926  ;;  %978 = vst.msk [vmem:[#allocation2 + $0xd0] sm:$0xff] %vm964_vm8, %v943_v29 }
 0x20d   : > { %970 = vst.msk [vmem:[#allocation2 + $0x50] sm:$0xff] %vm964_vm8, %v927_v59  ;;  %1335 = vrot.lane.b32.xlu1 %v3771_v30, %s2663_s21 }
 0x20e   : > { %1319 = vrot.lane.b32.xlu0 %v3774_v31, %s2663_s21  ;;  %s2417_s21 = sshll.u32 %s2063_s18, 7 }
 0x20f   : > { %v1330_v53 = vpop.permute.xlu1 %1329  ;;  %v1812_v52 = vld [vmem:[#allocation2 + $0xb0] sm:$0xff]  ;;  %s3965_s6 = scalar_lea.hbm %s4028_s2, %s2417_s21 }
 0x210   : > { %v1314_v58 = vpop.permute.xlu0 %1313  ;;  %v1796_v34 = vld [vmem:[#allocation2 + $0x30] sm:$0xff]  ;;  %1366 = vst.msk [vmem:[#allocation2 + $0xc0] sm:$0xff] %vm1353_vm12, %v1330_v53  ;;  %2009 = vmatmul.mubr.f32.gmra.mrb[6].mxu1 %v1812_v52 }
 0x211   : > { %1358 = vst.msk [vmem:[#allocation2 + $0x40] sm:$0xff] %vm1353_vm12, %v1314_v58  ;;  %1969 = vmatmul.mubr.f32.gmra.mrb[6].mxu0 %v1796_v34  ;;  %1432 = vrot.lane.b32.xlu1 %v3615_v1, %s2664_s25 }
 0x212   : > { %1416 = vrot.lane.b32.xlu0 %v3618_v3, %s2664_s25  ;;  %v2365_v3 = vld [vmem:[%s2762_s8 + $0xf9] sm:$0xff]  ;;  %s158_s8 = sand.u32 1, %s2625_s10  }
 0x213   : > { %v1041_v22 = vpop.permute.xlu1 %1040  ;;  %s2156_s28 = sshll.u32 %s158_s8, 7  ;;  %s3973_s12 = scalar_lea.sflag [#allocation4], %s158_s8 }
 0x214   : > { %v1025_v21 = vpop.permute.xlu0 %1024  ;;  %1076 = vst.msk [vmem:[#allocation2 + $0xd0] sm:$0xff] %vm1062_vm9, %v1041_v22  ;;  %s3921_s29 = scalar_lea.vmem [#allocation3], %s2156_s28 }
 0x215   : > { %1068 = vst.msk [vmem:[#allocation2 + $0x50] sm:$0xff] %vm1062_vm9, %v1025_v21  ;;  %1529 = vrot.lane.b32.xlu1 %v3748_v41, %s2665_s5  ;;  %s2066_s25 = sshll.u32 %s3921_s29, 4  ;;  %s3967_s25 = int_to_ptr.vmem [resolvable:$true] %s2066_s25 }
 0x216   : > { %1513 = vrot.lane.b32.xlu0 %v2341_v61, %s2665_s5  ;;  %s2555_s13 = scalar_lea.vmem %s3967_s25, 2048  ;;  %p2562_p4 = scmp.lt.s32.totalorder %s3967_s25, %s2560_s24 }
 0x217   : > { %v1427_v1 = vpop.permute.xlu1 %1426  ;;  %p2556_p0 = scmp.ne.s32.totalorder %s3967_s25, %s2555_s13 }
 0x218   : > { %v1411_v63 = vpop.permute.xlu0 %1410  ;;  %1463 = vst.msk [vmem:[#allocation2 + $0xc0] sm:$0xff] %vm1450_vm13, %v1427_v1 }
 0x219   : > { %1455 = vst.msk [vmem:[#allocation2 + $0x40] sm:$0xff] %vm1450_vm13, %v1411_v63  ;;  %1756 = vrot.lane.b32.xlu1 %v2397_v57, %s2651_s17  ;;  %p2557_p1 = pnand %p2556_p0, %p2735_p3 }
 0x21a   : > { %1740 = vrot.lane.b32.xlu0 %v2389_v62, %s2651_s17 }
 0x21b   : > { %v1138_v32 = vpop.permute.xlu1 %1137  ;;  %p2558_p2 = pneg %p2557_p1 }
 0x21c   : > { %v1122_v14 = vpop.permute.xlu0 %1121  ;;  %1173 = vst.msk [vmem:[#allocation2 + $0xd0] sm:$0xff] %vm1159_vm10, %v1138_v32 }
 0x21d   : > { %1165 = vst.msk [vmem:[#allocation2 + $0x50] sm:$0xff] %vm1159_vm10, %v1122_v14  ;;  %1627 = vrot.lane.b32.xlu1 %v2365_v3, %s2666_s26 }
 0x21e   : > { %1611 = vrot.lane.b32.xlu0 %v2357_v42, %s2666_s26  ;;  %s2561_s26 = scalar_lea.vmem %s2560_s24, 4096 }
 0x21f   : > { %v1524_v26 = vpop.permute.xlu1 %1523  ;;  %p2563_p5 = scmp.lt.s32.totalorder %s2561_s26, %s2555_s13 }
 0x220   : > { %v1508_v41 = vpop.permute.xlu0 %1507  ;;  %1560 = vst.msk [vmem:[#allocation2 + $0xc0] sm:$0xff] %vm1547_vm14, %v1524_v26 }
 0x221   : > { %1552 = vst.msk [vmem:[#allocation2 + $0x40] sm:$0xff] %vm1547_vm14, %v1508_v41  ;;  %p2564_p6 = por %p2563_p5, %p2562_p4 }
 0x223   : > { %v1751_v7 = vpop.permute.xlu1 %1750  ;;  %p2565_p7 = pnand %p2564_p6, %p2558_p2 }
 0x224   : > { %v1735_v10 = vpop.permute.xlu0 %1734  ;;  %1786 = vst.msk [vmem:[#allocation2 + $0xc8] sm:$0xff] %vm283_vm1, %v1751_v7 }
 0x225   : > { %1778 = vst.msk [vmem:[#allocation2 + $0x48] sm:$0xff] %vm283_vm1, %v1735_v10 }
 0x227   : > { %v848_v16 = vpop.permute.xlu1 %847 }
 0x228   : > { %v832_v17 = vpop.permute.xlu0 %831  ;;  %882 = vst.msk [vmem:[#allocation2 + $0xe0] sm:$0xff] %vm867_vm7, %v848_v16 }
 0x229   : > { %874 = vst.msk [vmem:[#allocation2 + $0x60] sm:$0xff] %vm867_vm7, %v832_v17 }
 0x22b   : > { %v1235_v8 = vpop.permute.xlu1 %1234  ;;  %v1815_v27 = vld [vmem:[#allocation2 + $0xc8] sm:$0xff] }
 0x22c   : > { %v1219_v11 = vpop.permute.xlu0 %1218  ;;  %v1799_v12 = vld [vmem:[#allocation2 + $0x48] sm:$0xff]  ;;  %1270 = vst.msk [vmem:[#allocation2 + $0xd0] sm:$0xff] %vm1256_vm11, %v1235_v8  ;;  %2410 = vmatprep.mubr.msk.f32.mxu1 %vm1840_vm15, %v1815_v27 }
 0x22d   : > { %1262 = vst.msk [vmem:[#allocation2 + $0x50] sm:$0xff] %vm1256_vm11, %v1219_v11  ;;  %2402 = vmatprep.mubr.msk.f32.mxu0 %vm1840_vm15, %v1799_v12 }
 0x22f   : > { %v1622_v13 = vpop.permute.xlu1 %1621 }
 0x230   : > { %v1606_v30 = vpop.permute.xlu0 %1605  ;;  %1658 = vst.msk [vmem:[#allocation2 + $0xc0] sm:$0xff] %vm1645_vm2, %v1622_v13 }
 0x231   : > { %1650 = vst.msk [vmem:[#allocation2 + $0x40] sm:$0xff] %vm1645_vm2, %v1606_v30 }
 0x233   : > { %v945_v31 = vpop.permute.xlu1 %944 }
 0x234   : > { %v929_v23 = vpop.permute.xlu0 %928  ;;  %979 = vst.msk [vmem:[#allocation2 + $0xe0] sm:$0xff] %vm964_vm8, %v945_v31 }
 0x235   : > { %971 = vst.msk [vmem:[#allocation2 + $0x60] sm:$0xff] %vm964_vm8, %v929_v23 }
 0x237   : > { %v1332_v35 = vpop.permute.xlu1 %1331  ;;  %v1814_v36 = vld [vmem:[#allocation2 + $0xc0] sm:$0xff] }
 0x238   : > { %v1316_v38 = vpop.permute.xlu0 %1315  ;;  %v1798_v24 = vld [vmem:[#allocation2 + $0x40] sm:$0xff]  ;;  %1367 = vst.msk [vmem:[#allocation2 + $0xd0] sm:$0xff] %vm1353_vm12, %v1332_v35  ;;  %2014 = vmatmul.mubr.f32.gmra.mrb[8].mxu1 %v1814_v36 }
 0x239   : > { %1359 = vst.msk [vmem:[#allocation2 + $0x50] sm:$0xff] %vm1353_vm12, %v1316_v38  ;;  %1974 = vmatmul.mubr.f32.gmra.mrb[8].mxu0 %v1798_v24 }
 0x23b   : > { %v1043_v25 = vpop.permute.xlu1 %1042 }
 0x23c   : > { %v1027_v37 = vpop.permute.xlu0 %1026  ;;  %1077 = vst.msk [vmem:[#allocation2 + $0xe0] sm:$0xff] %vm1062_vm9, %v1043_v25 }
 0x23d   : > { %1069 = vst.msk [vmem:[#allocation2 + $0x60] sm:$0xff] %vm1062_vm9, %v1027_v37 }
 0x23f   : > { %v1429_v40 = vpop.permute.xlu1 %1428 }
 0x240   : > { %v1413_v44 = vpop.permute.xlu0 %1412  ;;  %1464 = vst.msk [vmem:[#allocation2 + $0xd0] sm:$0xff] %vm1450_vm13, %v1429_v40 }
 0x241   : > { %1456 = vst.msk [vmem:[#allocation2 + $0x50] sm:$0xff] %vm1450_vm13, %v1413_v44 }
 0x243   : > { %v1140_v15 = vpop.permute.xlu1 %1139 }
 0x244   : > { %v1124_v56 = vpop.permute.xlu0 %1123  ;;  %1174 = vst.msk [vmem:[#allocation2 + $0xe0] sm:$0xff] %vm1159_vm10, %v1140_v15 }
 0x245   : > { %1166 = vst.msk [vmem:[#allocation2 + $0x60] sm:$0xff] %vm1159_vm10, %v1124_v56 }
 0x247   : > { %v1526_v60 = vpop.permute.xlu1 %1525 }
 0x248   : > { %v1510_v33 = vpop.permute.xlu0 %1509  ;;  %1561 = vst.msk [vmem:[#allocation2 + $0xd0] sm:$0xff] %vm1547_vm14, %v1526_v60 }
 0x249   : > { %1553 = vst.msk [vmem:[#allocation2 + $0x50] sm:$0xff] %vm1547_vm14, %v1510_v33 }
 0x24b   : > { %v1753_v18 = vpop.permute.xlu1 %1752 }
 0x24c   : > { %v1737_v39 = vpop.permute.xlu0 %1736  ;;  %1787 = vst.msk [vmem:[#allocation2 + $0xd8] sm:$0xff] %vm283_vm1, %v1753_v18 }
 0x24d   : > { %1779 = vst.msk [vmem:[#allocation2 + $0x58] sm:$0xff] %vm283_vm1, %v1737_v39 }
 0x24f   : > { %v850_v19 = vpop.permute.xlu1 %849 }
 0x250   : > { %v834_v9 = vpop.permute.xlu0 %833  ;;  %883 = vst.msk [vmem:[#allocation2 + $0xf0] sm:$0xff] %vm867_vm7, %v850_v19 }
 0x251   : > { %875 = vst.msk [vmem:[#allocation2 + $0x70] sm:$0xff] %vm867_vm7, %v834_v9 }
 0x253   : > { %v1237_v6 = vpop.permute.xlu1 %1236  ;;  %v1817_v54 = vld [vmem:[#allocation2 + $0xd8] sm:$0xff] }
 0x254   : > { %v1221_v46 = vpop.permute.xlu0 %1220  ;;  %v1801_v45 = vld [vmem:[#allocation2 + $0x58] sm:$0xff]  ;;  %1271 = vst.msk [vmem:[#allocation2 + $0xe0] sm:$0xff] %vm1256_vm11, %v1237_v6  ;;  %2411 = vmatprep.mubr.msk.f32.mxu1 %vm1840_vm15, %v1817_v54 }
 0x255   : > { %1263 = vst.msk [vmem:[#allocation2 + $0x60] sm:$0xff] %vm1256_vm11, %v1221_v46  ;;  %2403 = vmatprep.mubr.msk.f32.mxu0 %vm1840_vm15, %v1801_v45 }
 0x257   : > { %v1624_v28 = vpop.permute.xlu1 %1623 }
 0x258   : > { %v1608_v4 = vpop.permute.xlu0 %1607  ;;  %1659 = vst.msk [vmem:[#allocation2 + $0xd0] sm:$0xff] %vm1645_vm2, %v1624_v28 }
 0x259   : > { %1651 = vst.msk [vmem:[#allocation2 + $0x50] sm:$0xff] %vm1645_vm2, %v1608_v4 }
 0x25b   : > { %v947_v0 = vpop.permute.xlu1 %946 }
 0x25c   : > { %v931_v2 = vpop.permute.xlu0 %930  ;;  %980 = vst.msk [vmem:[#allocation2 + $0xf0] sm:$0xff] %vm964_vm8, %v947_v0 }
 0x25d   : > { %972 = vst.msk [vmem:[#allocation2 + $0x70] sm:$0xff] %vm964_vm8, %v931_v2 }
 0x25f   : > { %v1334_v55 = vpop.permute.xlu1 %1333  ;;  %v1816_v43 = vld [vmem:[#allocation2 + $0xd0] sm:$0xff] }
 0x260   : > { %v1318_v47 = vpop.permute.xlu0 %1317  ;;  %v1800_v48 = vld [vmem:[#allocation2 + $0x50] sm:$0xff]  ;;  %1368 = vst.msk [vmem:[#allocation2 + $0xe0] sm:$0xff] %vm1353_vm12, %v1334_v55  ;;  %2019 = vmatmul.mubr.f32.gmra.mrb[10].mxu1 %v1816_v43 }
 0x261   : > { %1360 = vst.msk [vmem:[#allocation2 + $0x60] sm:$0xff] %vm1353_vm12, %v1318_v47  ;;  %1979 = vmatmul.mubr.f32.gmra.mrb[10].mxu0 %v1800_v48 }
 0x263   : > { %v1045_v49 = vpop.permute.xlu1 %1044 }
 0x264   : > { %v1029_v50 = vpop.permute.xlu0 %1028  ;;  %1078 = vst.msk [vmem:[#allocation2 + $0xf0] sm:$0xff] %vm1062_vm9, %v1045_v49 }
 0x265   : > { %1070 = vst.msk [vmem:[#allocation2 + $0x70] sm:$0xff] %vm1062_vm9, %v1029_v50 }
 0x267   : > { %v1431_v51 = vpop.permute.xlu1 %1430 }
 0x268   : > { %v1415_v20 = vpop.permute.xlu0 %1414  ;;  %1465 = vst.msk [vmem:[#allocation2 + $0xe0] sm:$0xff] %vm1450_vm13, %v1431_v51 }
 0x269   : > { %1457 = vst.msk [vmem:[#allocation2 + $0x60] sm:$0xff] %vm1450_vm13, %v1415_v20 }
 0x26b   : > { %v1142_v29 = vpop.permute.xlu1 %1141  ;;  %v1955_v5 = vpop.f32.mrb[0].mxu0 }
 0x26c   : > { %v1126_v59 = vpop.permute.xlu0 %1125  ;;  %1175 = vst.msk [vmem:[#allocation2 + $0xf0] sm:$0xff] %vm1159_vm10, %v1142_v29  ;;  %v1995_v53 = vpop.f32.mrb[0].mxu1  ;;  %2034 = vst [vmem:[%s3921_s29] sm:$0xff] %v1955_v5 }
 0x26d   : > { %1167 = vst.msk [vmem:[#allocation2 + $0x70] sm:$0xff] %vm1159_vm10, %v1126_v59  ;;  %2042 = vst [vmem:[%s3921_s29 + $0x40] sm:$0xff] %v1995_v53  ;;  %v1957_v58 = vpop.f32.mrb[1].mxu0  ;;  %v1997_v34 = vpop.f32.mrb[1].mxu1 }
 0x26f   : > { %v1528_v52 = vpop.permute.xlu1 %1527 }
 0x270   : > { %v1512_v61 = vpop.permute.xlu0 %1511  ;;  %1562 = vst.msk [vmem:[#allocation2 + $0xe0] sm:$0xff] %vm1547_vm14, %v1528_v52 }
 0x271   : > { %1554 = vst.msk [vmem:[#allocation2 + $0x60] sm:$0xff] %vm1547_vm14, %v1512_v61 }
 0x273   : > { %v1755_v22 = vpop.permute.xlu1 %1754 }
 0x274   : > { %v1739_v21 = vpop.permute.xlu0 %1738  ;;  %1788 = vst.msk [vmem:[#allocation2 + $0xe8] sm:$0xff] %vm283_vm1, %v1755_v22 }
 0x275   : > { %1780 = vst.msk [vmem:[#allocation2 + $0x68] sm:$0xff] %vm283_vm1, %v1739_v21 }
 0x277   : > { %v1239_v57 = vpop.permute.xlu1 %1238 }
 0x278   : > { %v1223_v62 = vpop.permute.xlu0 %1222  ;;  %1272 = vst.msk [vmem:[#allocation2 + $0xf0] sm:$0xff] %vm1256_vm11, %v1239_v57 }
 0x279   : > { %1264 = vst.msk [vmem:[#allocation2 + $0x70] sm:$0xff] %vm1256_vm11, %v1223_v62 }
 0x27b   : > { %v1626_v1 = vpop.permute.xlu1 %1625  ;;  %v1819_v42 = vld [vmem:[#allocation2 + $0xe8] sm:$0xff] }
 0x27c   : > { %v1610_v63 = vpop.permute.xlu0 %1609  ;;  %v1803_v3 = vld [vmem:[#allocation2 + $0x68] sm:$0xff]  ;;  %1660 = vst.msk [vmem:[#allocation2 + $0xe0] sm:$0xff] %vm1645_vm2, %v1626_v1  ;;  %2412 = vmatprep.mubr.msk.f32.mxu1 %vm1840_vm15, %v1819_v42 }
 0x27d   : > { %1652 = vst.msk [vmem:[#allocation2 + $0x60] sm:$0xff] %vm1645_vm2, %v1610_v63  ;;  %2404 = vmatprep.mubr.msk.f32.mxu0 %vm1840_vm15, %v1803_v3 }
 0x27f   : > { %v1336_v32 = vpop.permute.xlu1 %1335 }
 0x280   : > { %v1320_v14 = vpop.permute.xlu0 %1319  ;;  %1369 = vst.msk [vmem:[#allocation2 + $0xf0] sm:$0xff] %vm1353_vm12, %v1336_v32 }
 0x281   : > { %1361 = vst.msk [vmem:[#allocation2 + $0x70] sm:$0xff] %vm1353_vm12, %v1320_v14 }
 0x283   : > { %v1433_v26 = vpop.permute.xlu1 %1432  ;;  %v1818_v10 = vld [vmem:[#allocation2 + $0xe0] sm:$0xff] }
 0x284   : > { %v1417_v41 = vpop.permute.xlu0 %1416  ;;  %v1802_v7 = vld [vmem:[#allocation2 + $0x60] sm:$0xff]  ;;  %1466 = vst.msk [vmem:[#allocation2 + $0xf0] sm:$0xff] %vm1450_vm13, %v1433_v26  ;;  %2024 = vmatmul.mubr.f32.gmra.mrb[12].mxu1 %v1818_v10 }
 0x285   : > { %1458 = vst.msk [vmem:[#allocation2 + $0x70] sm:$0xff] %vm1450_vm13, %v1417_v41  ;;  %1984 = vmatmul.mubr.f32.gmra.mrb[12].mxu0 %v1802_v7 }
 0x287   : > { %v1530_v16 = vpop.permute.xlu1 %1529 }
 0x288   : > { %v1514_v17 = vpop.permute.xlu0 %1513  ;;  %1563 = vst.msk [vmem:[#allocation2 + $0xf0] sm:$0xff] %vm1547_vm14, %v1530_v16 }
 0x289   : > { %1555 = vst.msk [vmem:[#allocation2 + $0x70] sm:$0xff] %vm1547_vm14, %v1514_v17 }
 0x28b   : > { %v1757_v8 = vpop.permute.xlu1 %1756 }
 0x28c   : > { %v1741_v11 = vpop.permute.xlu0 %1740  ;;  %1789 = vst.msk [vmem:[#allocation2 + $0xf8] sm:$0xff] %vm283_vm1, %v1757_v8 }
 0x28d   : > { %1781 = vst.msk [vmem:[#allocation2 + $0x78] sm:$0xff] %vm283_vm1, %v1741_v11 }
 0x28f   : > { %v1628_v12 = vpop.permute.xlu1 %1627 }
 0x290   : > { %v1612_v27 = vpop.permute.xlu0 %1611  ;;  %1661 = vst.msk [vmem:[#allocation2 + $0xf0] sm:$0xff] %vm1645_vm2, %v1628_v12 }
 0x291   : > { %1653 = vst.msk [vmem:[#allocation2 + $0x70] sm:$0xff] %vm1645_vm2, %v1612_v27 }
 0x293   : > { %v1960_v13 = vpop.f32.mrb[2].mxu0  ;;  %v1821_v23 = vld [vmem:[#allocation2 + $0xf8] sm:$0xff] }
 0x294   : > { %v2000_v30 = vpop.f32.mrb[2].mxu1  ;;  %v1805_v31 = vld [vmem:[#allocation2 + $0x78] sm:$0xff]  ;;  %2035 = vst [vmem:[%s3921_s29 + $0x8] sm:$0xff] %v1960_v13  ;;  %v1962_v35 = vpop.f32.mrb[3].mxu0  ;;  %2413 = vmatprep.mubr.msk.f32.mxu1 %vm1840_vm15, %v1821_v23 }
 0x295   : > { %2043 = vst [vmem:[%s3921_s29 + $0x48] sm:$0xff] %v2000_v30  ;;  %2405 = vmatprep.mubr.msk.f32.mxu0 %vm1840_vm15, %v1805_v31  ;;  %v2002_v38 = vpop.f32.mrb[3].mxu1 }
 0x297   : > { %v1820_v36 = vld [vmem:[#allocation2 + $0xf0] sm:$0xff] }
 0x298   : > { %v1804_v24 = vld [vmem:[#allocation2 + $0x70] sm:$0xff]  ;;  %2029 = vmatmul.mubr.f32.gmra.mrb[14].mxu1 %v1820_v36 }
 0x299   : > { %1989 = vmatmul.mubr.f32.gmra.mrb[14].mxu0 %v1804_v24 }
 0x2bb   : > { %v1965_v25 = vpop.f32.mrb[4].mxu0 }
 0x2bc   : > { %v2005_v37 = vpop.f32.mrb[4].mxu1  ;;  %2036 = vst [vmem:[%s3921_s29 + $0x10] sm:$0xff] %v1965_v25  ;;  %v1967_v40 = vpop.f32.mrb[5].mxu0 }
 0x2bd   : > { %2044 = vst [vmem:[%s3921_s29 + $0x50] sm:$0xff] %v2005_v37  ;;  %v2007_v44 = vpop.f32.mrb[5].mxu1 }
 0x2e3   : > { %v2010_v56 = vpop.f32.mrb[6].mxu1 }
 0x2e4   : > { %v1970_v15 = vpop.f32.mrb[6].mxu0  ;;  %2045 = vst [vmem:[%s3921_s29 + $0x58] sm:$0xff] %v2010_v56  ;;  %v2012_v33 = vpop.f32.mrb[7].mxu1 }
 0x2e5   : > { %2037 = vst [vmem:[%s3921_s29 + $0x18] sm:$0xff] %v1970_v15  ;;  %v1972_v60 = vpop.f32.mrb[7].mxu0 }
 0x30b   : > { %v2015_v39 = vpop.f32.mrb[8].mxu1 }
 0x30c   : > { %v1975_v18 = vpop.f32.mrb[8].mxu0  ;;  %2046 = vst [vmem:[%s3921_s29 + $0x60] sm:$0xff] %v2015_v39  ;;  %v2017_v9 = vpop.f32.mrb[9].mxu1 }
 0x30d   : > { %2038 = vst [vmem:[%s3921_s29 + $0x20] sm:$0xff] %v1975_v18  ;;  %v1977_v19 = vpop.f32.mrb[9].mxu0 }
 0x333   : > { %v2020_v46 = vpop.f32.mrb[10].mxu1 }
 0x334   : > { %v1980_v6 = vpop.f32.mrb[10].mxu0  ;;  %2047 = vst [vmem:[%s3921_s29 + $0x68] sm:$0xff] %v2020_v46  ;;  %v2022_v54 = vpop.f32.mrb[11].mxu1 }
 0x335   : > { %2039 = vst [vmem:[%s3921_s29 + $0x28] sm:$0xff] %v1980_v6  ;;  %v1982_v45 = vpop.f32.mrb[11].mxu0 }
 0x357   : > { %v2025_v4 = vpop.f32.mrb[12].mxu1 }
 0x358   : > { %v1985_v28 = vpop.f32.mrb[12].mxu0  ;;  %2048 = vst [vmem:[%s3921_s29 + $0x70] sm:$0xff] %v2025_v4  ;;  %v2027_v2 = vpop.f32.mrb[13].mxu1 }
 0x359   : > { %2040 = vst [vmem:[%s3921_s29 + $0x30] sm:$0xff] %v1985_v28  ;;  %v1987_v0 = vpop.f32.mrb[13].mxu0 }
 0x36b   : > { %v2030_v47 = vpop.f32.mrb[14].mxu1 }
 0x36c   : > { %v1990_v55 = vpop.f32.mrb[14].mxu0  ;;  %2049 = vst [vmem:[%s3921_s29 + $0x78] sm:$0xff] %v2030_v47  ;;  %v2032_v43 = vpop.f32.mrb[15].mxu1 }
 0x36d   : > { %2041 = vst [vmem:[%s3921_s29 + $0x38] sm:$0xff] %v1990_v55  ;;  %v1992_v48 = vpop.f32.mrb[15].mxu0 }
 0x36e   : > { %2568 = shalt.err (!%p2565_p7)
}
 0x36f   : > { %s2569_s8 = scalar_lea.hbm %s3965_s6, 2048  ;;  %s2573_s30 = scalar_lea.hbm %s4028_s2, 8192 }
 0x370   : > { %p2570_p9 = scmp.ne.s32.totalorder %s3965_s6, %s2569_s8  ;;  %p2574_p12 = scmp.lt.u32.totalorder %s3965_s6, %s4028_s2 }
 0x371   : > { %p2575_p13 = scmp.lt.u32.totalorder %s2573_s30, %s2569_s8  ;;  %p2577_p1 = scmp.lt.u32.totalorder %s2569_s8, %s3965_s6 }
 0x372   : > { %p2571_p10 = pnand %p2570_p9, %p2735_p3 }
 0x373   : > { %p2576_p0 = por %p2575_p13, %p2574_p12 }
 0x374   : > { %p2572_p11 = pneg %p2571_p10 }
 0x375   : > { %p2578_p2 = por %p2577_p1, %p2576_p0 }
 0x377   : > { %p2579_p4 = pnand %p2578_p2, %p2572_p11 }
 0x379   : > { %2582 = shalt.err (!%p2579_p4)
}
 0x37a   : > { %s2668_s21 = smov 128  }
 0x37b   : > { %2467 = dma.vmem_to_hbm [thread:$0]  (%p2735_p3), %s3967_s25, 2048, %s3965_s6, %s3973_s12, %s2668_s21, %s2668_s21, %s2651_s17  }
 0x37c PF: > { %p2473_p5 = scmp.ge.s32.totalorder %s2649_s16, 2  ;;  %s2081_s5 = sand.u32 1, %s2621_s9  }
 0x37d   : > { %s2082_s4 = scalar_lea.sflag [#allocation4], %s2081_s5 }
 0x37e   : > { %p2470_p6 = pnand %p2473_p5, %p2744_p8 }
 0x380   : > { %2616 = dma.done.wait (!%p2470_p6), %s2082_s4, 2048  }
 0x381   : > { %2618 = vsyncadd (!%p2470_p6), %s2082_s4, 4294965248  ;;  %s15_s16 = sadd.s32 1, %s2649_s16   ;;  %s4031_s9 = smov %s2625_s10 }
 0x382   : > { %p12_p7 = scmp.ge.s32.totalorder %s15_s16, 6   ;;  %s4032_s10 = smov %s2629_s11 }
 0x383   : > { %s4033_s11 = smov %s2753_s27  ;;  %s4034_s12 = smov %s2641_s14 }
 0x384   : > { %s4035_s13 = smov %s2645_s15  ;;  %s4036_s14 = smov %s4039_s19 }
 0x385   : > { %s4037_s15 = smov %s4043_s20  ;;  %14 = sbr.rel (!%p12_p7) target bundleno = 5 (0x5), region = 67 }
 0x38c   :  { %2087 = vsyncpa [#allocation4], 1 }
 0x38d   :  { %2089 = vsyncpa [#allocation4 + $0x1], 1 }

</bundles_post_ra>
